<compile_context>
chip_gen: v7x
topology: tpu7x:2x2x1
jax: 0.10.0
libtpu: 0.0.40
codegen_flags: <defaults>
</compile_context>

<pallas_src>
import functools

import jax
import jax.numpy as jnp
from jax import lax
from jax.experimental import pallas as pl
from jax.experimental.pallas import tpu as pltpu


def _round_up(n, m):
    return ((n + m - 1) // m) * m


def _cdiv(a, b):
    return (a + b - 1) // b


def _scaled(c, v):
    # Trace-time constant fold: skip the VPU multiply when the coefficient is exactly 1.0.
    return v if c == 1.0 else c * v


def _rk4_kernel(h, x_ref, w0_ref, b0_ref, w1_ref, b1_ref, w2_ref, b2_ref, o_ref):
    x = x_ref[...]                              # (TB, D) f32
    w0 = w0_ref[...]                            # (D, D) f32/bf16, pre-transposed (x @ W)
    w1 = w1_ref[...]                            # loaded once, reused for k2 AND k3
    w2 = w2_ref[...]
    tb, d = x.shape
    # Hoisted bias broadcasts (JAX does not CSE broadcast_in_dim; b1 is used twice).
    b0 = jnp.broadcast_to(b0_ref[...], (tb, d))
    b1 = jnp.broadcast_to(b1_ref[...], (tb, d))
    b2 = jnp.broadcast_to(b2_ref[...], (tb, d))

    def linear(z, w, b):
        zd = z if z.dtype == w.dtype else z.astype(w.dtype)
        return jnp.dot(zd, w, preferred_element_type=jnp.float32) + b

    # tanh stays f32 (v5e has no bf16 EUP); incremental accumulation keeps only a few
    # (TB, D) f32 values live at once.
    # TODO(synk): optional bf16 tanh path for v6e/v7x if a bundle dump shows the EUP binding.
    t1 = jnp.tanh(linear(x, w0, b0))
    acc = x + _scaled(h / 6.0, t1)
    t2 = jnp.tanh(linear(x + _scaled(0.5 * h, t1), w1, b1))       # t1 dead after this
    acc = acc + _scaled(h / 3.0, t2)
    t3 = jnp.tanh(linear(x + _scaled(0.5 * h, t2), w1, b1))       # t2 dead after this
    acc = acc + _scaled(h / 3.0, t3)
    t4 = jnp.tanh(linear(x + _scaled(h, t3), w2, b2))             # t3 dead after this
    acc = acc + _scaled(h / 6.0, t4)
    o_ref[...] = acc.astype(o_ref.dtype)


def _vmem_capacity_bytes():
    try:
        return int(pltpu.get_tpu_info().vmem_capacity_bytes)
    except Exception:
        return 64 << 20            # conservative default = v7x per-TensorCore VMEM


def resnet_layer_rk4(x, params, *, h=1.0, tb=None, use_bf16_weights=None):
    """x: (B, D) float32.  params: dict w0,b0,w1,b1,w2,b2 in PyTorch layout (w: (out, in))."""
    B, D = x.shape
    D_pad = _round_up(max(D, 128), 128)          # lane-dense feature dim (zero-pad is exact)

    # Generation-aware VMEM budget (v7x 64 MiB/TC, v5e/v6e 128 MiB); 20% headroom for
    # Mosaic internal scratch and spill slack.
    budget = int(0.8 * _vmem_capacity_bytes())

    if use_bf16_weights is None:
        # Explicit opt-in for bf16 matmul numerics; auto only when f32 weights would crowd
        # out the x/out pipeline, so precision does not silently change with model size.
        use_bf16_weights = (3 * D_pad * D_pad * 4) > budget // 2
    wbytes = 2 if use_bf16_weights else 4
    weight_bytes = 3 * D_pad * D_pad * wbytes + 3 * D_pad * 4   # single-buffered constants
    # TODO(synk): tile the output-feature dim when even bf16 weights exceed the VMEM budget.

    # Batch tile: as large as the budget allows, but >=4 grid steps when B permits.
    per_row_bytes = 10 * D_pad * 4      # x + out double-buffered + ~live f32 intermediates
    avail = max(0, budget - weight_bytes)
    tb_cap = int(min(1024, max(8, (avail // per_row_bytes // 8) * 8)))
    if tb is None:
        target_steps = 4                         # >=2 steps per v7x core; pipeline steady state
        steps = min(target_steps, _cdiv(B, 8))   # don't over-pad tiny batches
        steps = max(steps, _cdiv(B, tb_cap))     # respect the VMEM-derived tile cap
        tb = min(tb_cap, _round_up(_cdiv(B, steps), 8))
    TB = max(8, _round_up(int(tb), 8))
    B_pad = _round_up(B, TB)
    grid = (B_pad // TB,)

    w_dtype = jnp.bfloat16 if use_bf16_weights else jnp.float32

    # --- wrapper glue (not the hot path): transpose to (in, out), zero-pad to D_pad ---
    def prep_w(w):
        wt = jnp.asarray(w, jnp.float32).T
        wt = jnp.pad(wt, ((0, D_pad - D), (0, D_pad - D)))
        return wt.astype(w_dtype)

    def prep_b(b):
        return jnp.pad(jnp.asarray(b, jnp.float32), (0, D_pad - D)).reshape(1, D_pad)

    w0, w1, w2 = prep_w(params["w0"]), prep_w(params["w1"]), prep_w(params["w2"])
    b0, b1, b2 = prep_b(params["b0"]), prep_b(params["b1"]), prep_b(params["b2"])

    x_p = jnp.asarray(x, jnp.float32)
    if (B_pad, D_pad) != (B, D):
        # Zero feature-padding is exact: padded weight rows/cols and biases are 0, so padded
        # lanes of every k_i are tanh(0)=0.  Padded batch rows (< TB total) are sliced off.
        x_p = jnp.pad(x_p, ((0, B_pad - B), (0, D_pad - D)))

    kernel = functools.partial(_rk4_kernel, float(h))
    row_spec = pl.BlockSpec((TB, D_pad), lambda i: (i, 0))       # x / out tiles pipeline

    def build(single_buffer_consts):
        if single_buffer_consts:
            # Constant index_map => nothing to prefetch after step 0: single-buffer the
            # weights/biases so they cost 1x (not 2x) VMEM and stay resident.
            w_spec = pl.BlockSpec((D_pad, D_pad), lambda i: (0, 0),
                                  pipeline_mode=pl.Buffered(1))
            b_spec = pl.BlockSpec((1, D_pad), lambda i: (0, 0),
                                  pipeline_mode=pl.Buffered(1))
        else:
            w_spec = pl.BlockSpec((D_pad, D_pad), lambda i: (0, 0))
            b_spec = pl.BlockSpec((1, D_pad), lambda i: (0, 0))
        return pl.pallas_call(
            kernel,
            out_shape=jax.ShapeDtypeStruct((B_pad, D_pad), jnp.float32),
            grid=grid,
            in_specs=[row_spec, w_spec, b_spec, w_spec, b_spec, w_spec, b_spec],
            out_specs=row_spec,
            compiler_params=pltpu.CompilerParams(
                dimension_semantics=("parallel",),
                vmem_limit_bytes=budget,
            ),
        )

    args = (x_p, w0, b0, w1, b1, w2, b2)
    try:
        out = build(True)(*args)
    except Exception:
        # Fallback for jax builds that reject pl.Buffered(1) on a grid-invariant spec;
        # identical semantics, weights just stay double-buffered.
        out = build(False)(*args)

    if (B_pad, D_pad) != (B, D):
        out = out[:B, :D]
    return out.astype(x.dtype)


def _reference(x, params, h=1.0):
    def linear(z, w, b):
        return jnp.dot(z, w.T, precision=lax.Precision.HIGHEST) + b

    k1 = h * jnp.tanh(linear(x, params["w0"], params["b0"]))
    k2 = h * jnp.tanh(linear(x + 0.5 * k1, params["w1"], params["b1"]))
    k3 = h * jnp.tanh(linear(x + 0.5 * k2, params["w1"], params["b1"]))
    k4 = h * jnp.tanh(linear(x + k3, params["w2"], params["b2"]))
    return x + k1 / 6.0 + k2 / 3.0 + k3 / 3.0 + k4 / 6.0


def _init_params(key, D):
    # Deterministic init mimicking nn.Linear default (uniform +/- 1/sqrt(D)).
    bound = 1.0 / (D ** 0.5)
    ks = jax.random.split(key, 6)
    return {
        "w0": jax.random.uniform(ks[0], (D, D), jnp.float32, -bound, bound),
        "b0": jax.random.uniform(ks[1], (D,), jnp.float32, -bound, bound),
        "w1": jax.random.uniform(ks[2], (D, D), jnp.float32, -bound, bound),
        "b1": jax.random.uniform(ks[3], (D,), jnp.float32, -bound, bound),
        "w2": jax.random.uniform(ks[4], (D, D), jnp.float32, -bound, bound),
        "b2": jax.random.uniform(ks[5], (D,), jnp.float32, -bound, bound),
    }


if __name__ == "__main__":
    key = jax.random.PRNGKey(0)
    kx, kp, kx2, kp2 = jax.random.split(key, 4)

    # Primary shape: lane-dense D with a 4-step grid (TB=64 here), so the x/out DMA pipeline
    # has a steady state and both v7x TensorCores get work.
    B, D = 256, 128
    x = jax.random.normal(kx, (B, D), dtype=jnp.float32)
    params = _init_params(kp, D)
    out = jax.block_until_ready(resnet_layer_rk4(x, params))
    ref = _reference(x, params)
    assert out.shape == (B, D) and out.dtype == jnp.float32
    assert jnp.allclose(out, ref, atol=1e-5, rtol=1e-5)

    # Module-typical tiny shape (B=8, D=32): exercises the zero-pad-to-128-lanes path and a
    # single-step grid.
    B2, D2 = 8, 32
    x2 = jax.random.normal(kx2, (B2, D2), dtype=jnp.float32)
    params2 = _init_params(kp2, D2)
    out2 = jax.block_until_ready(resnet_layer_rk4(x2, params2))
    ref2 = _reference(x2, params2)
    assert out2.shape == (B2, D2) and out2.dtype == jnp.float32
    assert jnp.allclose(out2, ref2, atol=1e-5, rtol=1e-5)

    print("KERNEL_OK")
</pallas_src>

<mosaic_0001>
module attributes {stable_mosaic.version = 11 : i64} {
  func.func @_rk4_kernel(%arg0: i32, %arg1: memref<64x128xf32, #tpu.memory_space<vmem>>, %arg2: memref<128x128xf32, #tpu.memory_space<vmem>>, %arg3: memref<1x128xf32, #tpu.memory_space<vmem>>, %arg4: memref<128x128xf32, #tpu.memory_space<vmem>>, %arg5: memref<1x128xf32, #tpu.memory_space<vmem>>, %arg6: memref<128x128xf32, #tpu.memory_space<vmem>>, %arg7: memref<1x128xf32, #tpu.memory_space<vmem>>, %arg8: memref<64x128xf32, #tpu.memory_space<vmem>>) attributes {dimension_semantics = [#tpu.dimension_semantics<parallel>], iteration_bounds = array<i64: 4>, scalar_prefetch = 0 : i64, scratch_operands = 0 : i64, tpu.core_type = #tpu.core_type<tc>, window_params = [{transform_indices = @transform_0, window_bounds = array<i64: 64, 128>}, {pipeline_mode = #tpu.pipeline_mode<synchronous>, transform_indices = @transform_1, window_bounds = array<i64: 128, 128>}, {pipeline_mode = #tpu.pipeline_mode<synchronous>, transform_indices = @transform_2, window_bounds = array<i64: 1, 128>}, {pipeline_mode = #tpu.pipeline_mode<synchronous>, transform_indices = @transform_3, window_bounds = array<i64: 128, 128>}, {pipeline_mode = #tpu.pipeline_mode<synchronous>, transform_indices = @transform_4, window_bounds = array<i64: 1, 128>}, {pipeline_mode = #tpu.pipeline_mode<synchronous>, transform_indices = @transform_5, window_bounds = array<i64: 128, 128>}, {pipeline_mode = #tpu.pipeline_mode<synchronous>, transform_indices = @transform_6, window_bounds = array<i64: 1, 128>}, {transform_indices = @transform_7, window_bounds = array<i64: 64, 128>}]} {
    %c0 = arith.constant 0 : index
    %c0_0 = arith.constant 0 : index
    %0 = vector.load %arg1[%c0, %c0_0] : memref<64x128xf32, #tpu.memory_space<vmem>>, vector<64x128xf32>
    %c0_1 = arith.constant 0 : index
    %c0_2 = arith.constant 0 : index
    %1 = vector.load %arg2[%c0_1, %c0_2] : memref<128x128xf32, #tpu.memory_space<vmem>>, vector<128x128xf32>
    %c0_3 = arith.constant 0 : index
    %c0_4 = arith.constant 0 : index
    %2 = vector.load %arg4[%c0_3, %c0_4] : memref<128x128xf32, #tpu.memory_space<vmem>>, vector<128x128xf32>
    %c0_5 = arith.constant 0 : index
    %c0_6 = arith.constant 0 : index
    %3 = vector.load %arg6[%c0_5, %c0_6] : memref<128x128xf32, #tpu.memory_space<vmem>>, vector<128x128xf32>
    %c0_7 = arith.constant 0 : index
    %c0_8 = arith.constant 0 : index
    %4 = vector.load %arg3[%c0_7, %c0_8] : memref<1x128xf32, #tpu.memory_space<vmem>>, vector<1x128xf32>
    %5 = vector.shape_cast %4 : vector<1x128xf32> to vector<1x128xf32>
    %6 = vector.broadcast %5 : vector<1x128xf32> to vector<64x128xf32>
    %c0_9 = arith.constant 0 : index
    %c0_10 = arith.constant 0 : index
    %7 = vector.load %arg5[%c0_9, %c0_10] : memref<1x128xf32, #tpu.memory_space<vmem>>, vector<1x128xf32>
    %8 = vector.shape_cast %7 : vector<1x128xf32> to vector<1x128xf32>
    %9 = vector.broadcast %8 : vector<1x128xf32> to vector<64x128xf32>
    %c0_11 = arith.constant 0 : index
    %c0_12 = arith.constant 0 : index
    %10 = vector.load %arg7[%c0_11, %c0_12] : memref<1x128xf32, #tpu.memory_space<vmem>>, vector<1x128xf32>
    %11 = vector.shape_cast %10 : vector<1x128xf32> to vector<1x128xf32>
    %12 = vector.broadcast %11 : vector<1x128xf32> to vector<64x128xf32>
    %cst = arith.constant dense<0.000000e+00> : vector<64x128xf32>
    %13 = tpu.matmul %0, %1, %cst {dimension_numbers = #tpu.dot_dimension_numbers<[1], [0], [0], [1], [0, 0, 1, 1], [], []>} : vector<64x128xf32>, vector<128x128xf32>, vector<64x128xf32> -> vector<64x128xf32>
    %14 = arith.addf %13, %6 : vector<64x128xf32>
    %15 = math.tanh %14 : vector<64x128xf32>
    %cst_13 = arith.constant 0.166666672 : f32
    %16 = vector.broadcast %cst_13 : f32 to vector<64x128xf32>
    %17 = arith.mulf %16, %15 : vector<64x128xf32>
    %18 = arith.addf %0, %17 : vector<64x128xf32>
    %cst_14 = arith.constant 5.000000e-01 : f32
    %19 = vector.broadcast %cst_14 : f32 to vector<64x128xf32>
    %20 = arith.mulf %19, %15 : vector<64x128xf32>
    %21 = arith.addf %0, %20 : vector<64x128xf32>
    %cst_15 = arith.constant dense<0.000000e+00> : vector<64x128xf32>
    %22 = tpu.matmul %21, %2, %cst_15 {dimension_numbers = #tpu.dot_dimension_numbers<[1], [0], [0], [1], [0, 0, 1, 1], [], []>} : vector<64x128xf32>, vector<128x128xf32>, vector<64x128xf32> -> vector<64x128xf32>
    %23 = arith.addf %22, %9 : vector<64x128xf32>
    %24 = math.tanh %23 : vector<64x128xf32>
    %cst_16 = arith.constant 0.333333343 : f32
    %25 = vector.broadcast %cst_16 : f32 to vector<64x128xf32>
    %26 = arith.mulf %25, %24 : vector<64x128xf32>
    %27 = arith.addf %18, %26 : vector<64x128xf32>
    %cst_17 = arith.constant 5.000000e-01 : f32
    %28 = vector.broadcast %cst_17 : f32 to vector<64x128xf32>
    %29 = arith.mulf %28, %24 : vector<64x128xf32>
    %30 = arith.addf %0, %29 : vector<64x128xf32>
    %cst_18 = arith.constant dense<0.000000e+00> : vector<64x128xf32>
    %31 = tpu.matmul %30, %2, %cst_18 {dimension_numbers = #tpu.dot_dimension_numbers<[1], [0], [0], [1], [0, 0, 1, 1], [], []>} : vector<64x128xf32>, vector<128x128xf32>, vector<64x128xf32> -> vector<64x128xf32>
    %32 = arith.addf %31, %9 : vector<64x128xf32>
    %33 = math.tanh %32 : vector<64x128xf32>
    %cst_19 = arith.constant 0.333333343 : f32
    %34 = vector.broadcast %cst_19 : f32 to vector<64x128xf32>
    %35 = arith.mulf %34, %33 : vector<64x128xf32>
    %36 = arith.addf %27, %35 : vector<64x128xf32>
    %37 = arith.addf %0, %33 : vector<64x128xf32>
    %cst_20 = arith.constant dense<0.000000e+00> : vector<64x128xf32>
    %38 = tpu.matmul %37, %3, %cst_20 {dimension_numbers = #tpu.dot_dimension_numbers<[1], [0], [0], [1], [0, 0, 1, 1], [], []>} : vector<64x128xf32>, vector<128x128xf32>, vector<64x128xf32> -> vector<64x128xf32>
    %39 = arith.addf %38, %12 : vector<64x128xf32>
    %40 = math.tanh %39 : vector<64x128xf32>
    %cst_21 = arith.constant 0.166666672 : f32
    %41 = vector.broadcast %cst_21 : f32 to vector<64x128xf32>
    %42 = arith.mulf %41, %40 : vector<64x128xf32>
    %43 = arith.addf %36, %42 : vector<64x128xf32>
    %c0_22 = arith.constant 0 : index
    %c0_23 = arith.constant 0 : index
    %44 = vector.load %arg8[%c0_22, %c0_23] : memref<64x128xf32, #tpu.memory_space<vmem>>, vector<64x128xf32>
    tpu.vector_store %arg8[%c0_22, %c0_23], %43 {strides = array<i32>} : memref<64x128xf32, #tpu.memory_space<vmem>>, vector<64x128xf32>,
    return
  }
  func.func @transform_0(%arg0: i32) -> (i32, i32) {
    %c0_i32 = arith.constant 0 : i32
    %c0_i32_0 = arith.constant 0 : i32
    return %arg0, %c0_i32 : i32, i32
  }
  func.func @transform_1(%arg0: i32) -> (i32, i32) {
    %c0_i32 = arith.constant 0 : i32
    %c0_i32_0 = arith.constant 0 : i32
    %c0_i32_1 = arith.constant 0 : i32
    return %c0_i32, %c0_i32_0 : i32, i32
  }
  func.func @transform_2(%arg0: i32) -> (i32, i32) {
    %c0_i32 = arith.constant 0 : i32
    %c0_i32_0 = arith.constant 0 : i32
    %c0_i32_1 = arith.constant 0 : i32
    return %c0_i32, %c0_i32_0 : i32, i32
  }
  func.func @transform_3(%arg0: i32) -> (i32, i32) {
    %c0_i32 = arith.constant 0 : i32
    %c0_i32_0 = arith.constant 0 : i32
    %c0_i32_1 = arith.constant 0 : i32
    return %c0_i32, %c0_i32_0 : i32, i32
  }
  func.func @transform_4(%arg0: i32) -> (i32, i32) {
    %c0_i32 = arith.constant 0 : i32
    %c0_i32_0 = arith.constant 0 : i32
    %c0_i32_1 = arith.constant 0 : i32
    return %c0_i32, %c0_i32_0 : i32, i32
  }
  func.func @transform_5(%arg0: i32) -> (i32, i32) {
    %c0_i32 = arith.constant 0 : i32
    %c0_i32_0 = arith.constant 0 : i32
    %c0_i32_1 = arith.constant 0 : i32
    return %c0_i32, %c0_i32_0 : i32, i32
  }
  func.func @transform_6(%arg0: i32) -> (i32, i32) {
    %c0_i32 = arith.constant 0 : i32
    %c0_i32_0 = arith.constant 0 : i32
    %c0_i32_1 = arith.constant 0 : i32
    return %c0_i32, %c0_i32_0 : i32, i32
  }
  func.func @transform_7(%arg0: i32) -> (i32, i32) {
    %c0_i32 = arith.constant 0 : i32
    %c0_i32_0 = arith.constant 0 : i32
    return %arg0, %c0_i32 : i32, i32
  }
}

module attributes {stable_mosaic.version = 11 : i64} {
  func.func @_rk4_kernel(%arg0: i32, %arg1: memref<64x128xf32, #tpu.memory_space<vmem>>, %arg2: memref<128x128xf32, #tpu.memory_space<vmem>>, %arg3: memref<1x128xf32, #tpu.memory_space<vmem>>, %arg4: memref<128x128xf32, #tpu.memory_space<vmem>>, %arg5: memref<1x128xf32, #tpu.memory_space<vmem>>, %arg6: memref<128x128xf32, #tpu.memory_space<vmem>>, %arg7: memref<1x128xf32, #tpu.memory_space<vmem>>, %arg8: memref<64x128xf32, #tpu.memory_space<vmem>>) attributes {dimension_semantics = [#tpu.dimension_semantics<parallel>], iteration_bounds = array<i64: 4>, scalar_prefetch = 0 : i64, scratch_operands = 0 : i64, tpu.core_type = #tpu.core_type<tc>, window_params = [{transform_indices = @transform_0, window_bounds = array<i64: 64, 128>}, {pipeline_mode = #tpu.pipeline_mode<synchronous>, transform_indices = @transform_1, window_bounds = array<i64: 128, 128>}, {pipeline_mode = #tpu.pipeline_mode<synchronous>, transform_indices = @transform_2, window_bounds = array<i64: 1, 128>}, {pipeline_mode = #tpu.pipeline_mode<synchronous>, transform_indices = @transform_3, window_bounds = array<i64: 128, 128>}, {pipeline_mode = #tpu.pipeline_mode<synchronous>, transform_indices = @transform_4, window_bounds = array<i64: 1, 128>}, {pipeline_mode = #tpu.pipeline_mode<synchronous>, transform_indices = @transform_5, window_bounds = array<i64: 128, 128>}, {pipeline_mode = #tpu.pipeline_mode<synchronous>, transform_indices = @transform_6, window_bounds = array<i64: 1, 128>}, {transform_indices = @transform_7, window_bounds = array<i64: 64, 128>}]} {
    %c0 = arith.constant 0 : index
    %c0_0 = arith.constant 0 : index
    %0 = vector.load %arg1[%c0, %c0_0] : memref<64x128xf32, #tpu.memory_space<vmem>>, vector<64x128xf32>
    %c0_1 = arith.constant 0 : index
    %c0_2 = arith.constant 0 : index
    %1 = vector.load %arg2[%c0_1, %c0_2] : memref<128x128xf32, #tpu.memory_space<vmem>>, vector<128x128xf32>
    %c0_3 = arith.constant 0 : index
    %c0_4 = arith.constant 0 : index
    %2 = vector.load %arg4[%c0_3, %c0_4] : memref<128x128xf32, #tpu.memory_space<vmem>>, vector<128x128xf32>
    %c0_5 = arith.constant 0 : index
    %c0_6 = arith.constant 0 : index
    %3 = vector.load %arg6[%c0_5, %c0_6] : memref<128x128xf32, #tpu.memory_space<vmem>>, vector<128x128xf32>
    %c0_7 = arith.constant 0 : index
    %c0_8 = arith.constant 0 : index
    %4 = vector.load %arg3[%c0_7, %c0_8] : memref<1x128xf32, #tpu.memory_space<vmem>>, vector<1x128xf32>
    %5 = vector.shape_cast %4 : vector<1x128xf32> to vector<1x128xf32>
    %6 = vector.broadcast %5 : vector<1x128xf32> to vector<64x128xf32>
    %c0_9 = arith.constant 0 : index
    %c0_10 = arith.constant 0 : index
    %7 = vector.load %arg5[%c0_9, %c0_10] : memref<1x128xf32, #tpu.memory_space<vmem>>, vector<1x128xf32>
    %8 = vector.shape_cast %7 : vector<1x128xf32> to vector<1x128xf32>
    %9 = vector.broadcast %8 : vector<1x128xf32> to vector<64x128xf32>
    %c0_11 = arith.constant 0 : index
    %c0_12 = arith.constant 0 : index
    %10 = vector.load %arg7[%c0_11, %c0_12] : memref<1x128xf32, #tpu.memory_space<vmem>>, vector<1x128xf32>
    %11 = vector.shape_cast %10 : vector<1x128xf32> to vector<1x128xf32>
    %12 = vector.broadcast %11 : vector<1x128xf32> to vector<64x128xf32>
    %cst = arith.constant dense<0.000000e+00> : vector<64x128xf32>
    %13 = tpu.matmul %0, %1, %cst {dimension_numbers = #tpu.dot_dimension_numbers<[1], [0], [0], [1], [0, 0, 1, 1], [], []>} : vector<64x128xf32>, vector<128x128xf32>, vector<64x128xf32> -> vector<64x128xf32>
    %14 = arith.addf %13, %6 : vector<64x128xf32>
    %15 = math.tanh %14 : vector<64x128xf32>
    %cst_13 = arith.constant 0.166666672 : f32
    %16 = vector.broadcast %cst_13 : f32 to vector<64x128xf32>
    %17 = arith.mulf %16, %15 : vector<64x128xf32>
    %18 = arith.addf %0, %17 : vector<64x128xf32>
    %cst_14 = arith.constant 5.000000e-01 : f32
    %19 = vector.broadcast %cst_14 : f32 to vector<64x128xf32>
    %20 = arith.mulf %19, %15 : vector<64x128xf32>
    %21 = arith.addf %0, %20 : vector<64x128xf32>
    %cst_15 = arith.constant dense<0.000000e+00> : vector<64x128xf32>
    %22 = tpu.matmul %21, %2, %cst_15 {dimension_numbers = #tpu.dot_dimension_numbers<[1], [0], [0], [1], [0, 0, 1, 1], [], []>} : vector<64x128xf32>, vector<128x128xf32>, vector<64x128xf32> -> vector<64x128xf32>
    %23 = arith.addf %22, %9 : vector<64x128xf32>
    %24 = math.tanh %23 : vector<64x128xf32>
    %cst_16 = arith.constant 0.333333343 : f32
    %25 = vector.broadcast %cst_16 : f32 to vector<64x128xf32>
    %26 = arith.mulf %25, %24 : vector<64x128xf32>
    %27 = arith.addf %18, %26 : vector<64x128xf32>
    %cst_17 = arith.constant 5.000000e-01 : f32
    %28 = vector.broadcast %cst_17 : f32 to vector<64x128xf32>
    %29 = arith.mulf %28, %24 : vector<64x128xf32>
    %30 = arith.addf %0, %29 : vector<64x128xf32>
    %cst_18 = arith.constant dense<0.000000e+00> : vector<64x128xf32>
    %31 = tpu.matmul %30, %2, %cst_18 {dimension_numbers = #tpu.dot_dimension_numbers<[1], [0], [0], [1], [0, 0, 1, 1], [], []>} : vector<64x128xf32>, vector<128x128xf32>, vector<64x128xf32> -> vector<64x128xf32>
    %32 = arith.addf %31, %9 : vector<64x128xf32>
    %33 = math.tanh %32 : vector<64x128xf32>
    %cst_19 = arith.constant 0.333333343 : f32
    %34 = vector.broadcast %cst_19 : f32 to vector<64x128xf32>
    %35 = arith.mulf %34, %33 : vector<64x128xf32>
    %36 = arith.addf %27, %35 : vector<64x128xf32>
    %37 = arith.addf %0, %33 : vector<64x128xf32>
    %cst_20 = arith.constant dense<0.000000e+00> : vector<64x128xf32>
    %38 = tpu.matmul %37, %3, %cst_20 {dimension_numbers = #tpu.dot_dimension_numbers<[1], [0], [0], [1], [0, 0, 1, 1], [], []>} : vector<64x128xf32>, vector<128x128xf32>, vector<64x128xf32> -> vector<64x128xf32>
    %39 = arith.addf %38, %12 : vector<64x128xf32>
    %40 = math.tanh %39 : vector<64x128xf32>
    %cst_21 = arith.constant 0.166666672 : f32
    %41 = vector.broadcast %cst_21 : f32 to vector<64x128xf32>
    %42 = arith.mulf %41, %40 : vector<64x128xf32>
    %43 = arith.addf %36, %42 : vector<64x128xf32>
    %c0_22 = arith.constant 0 : index
    %c0_23 = arith.constant 0 : index
    %44 = vector.load %arg8[%c0_22, %c0_23] : memref<64x128xf32, #tpu.memory_space<vmem>>, vector<64x128xf32>
    tpu.vector_store %arg8[%c0_22, %c0_23], %43 {strides = array<i32>} : memref<64x128xf32, #tpu.memory_space<vmem>>, vector<64x128xf32>,
    return
  }
  func.func @transform_0(%arg0: i32) -> (i32, i32) {
    %c0_i32 = arith.constant 0 : i32
    %c0_i32_0 = arith.constant 0 : i32
    return %arg0, %c0_i32 : i32, i32
  }
  func.func @transform_1(%arg0: i32) -> (i32, i32) {
    %c0_i32 = arith.constant 0 : i32
    %c0_i32_0 = arith.constant 0 : i32
    %c0_i32_1 = arith.constant 0 : i32
    return %c0_i32, %c0_i32_0 : i32, i32
  }
  func.func @transform_2(%arg0: i32) -> (i32, i32) {
    %c0_i32 = arith.constant 0 : i32
    %c0_i32_0 = arith.constant 0 : i32
    %c0_i32_1 = arith.constant 0 : i32
    return %c0_i32, %c0_i32_0 : i32, i32
  }
  func.func @transform_3(%arg0: i32) -> (i32, i32) {
    %c0_i32 = arith.constant 0 : i32
    %c0_i32_0 = arith.constant 0 : i32
    %c0_i32_1 = arith.constant 0 : i32
    return %c0_i32, %c0_i32_0 : i32, i32
  }
  func.func @transform_4(%arg0: i32) -> (i32, i32) {
    %c0_i32 = arith.constant 0 : i32
    %c0_i32_0 = arith.constant 0 : i32
    %c0_i32_1 = arith.constant 0 : i32
    return %c0_i32, %c0_i32_0 : i32, i32
  }
  func.func @transform_5(%arg0: i32) -> (i32, i32) {
    %c0_i32 = arith.constant 0 : i32
    %c0_i32_0 = arith.constant 0 : i32
    %c0_i32_1 = arith.constant 0 : i32
    return %c0_i32, %c0_i32_0 : i32, i32
  }
  func.func @transform_6(%arg0: i32) -> (i32, i32) {
    %c0_i32 = arith.constant 0 : i32
    %c0_i32_0 = arith.constant 0 : i32
    %c0_i32_1 = arith.constant 0 : i32
    return %c0_i32, %c0_i32_0 : i32, i32
  }
  func.func @transform_7(%arg0: i32) -> (i32, i32) {
    %c0_i32 = arith.constant 0 : i32
    %c0_i32_0 = arith.constant 0 : i32
    return %arg0, %c0_i32 : i32, i32
  }
}

</mosaic_0001>

<bundles_post_ra>
// kernel: tpu_custom_call.1
= control target key start
LH: loop header
LB: loop body
LE: loop exit
PB: predicated region body
PF: predicated region fallthrough
CT: control target
= control target key end

     0   :  { %12 = vsyncpa [#allocation3], 0  ;;  %s2331_s0 = inlined_call_operand.hbm [shape: f32[256,128], index: 0, kind: input, shape index: {}]   ;;  %s2332_s1 = inlined_call_operand.hbm [shape: f32[128,128], index: 1, kind: input, shape index: {}]   ;;  %s2333_s2 = inlined_call_operand.vmem [shape: f32[1,128], index: 2, kind: input, shape index: {}]   ;;  %s2334_s3 = inlined_call_operand.hbm [shape: f32[128,128], index: 3, kind: input, shape index: {}]   ;;  %s2335_s4 = inlined_call_operand.vmem [shape: f32[1,128], index: 4, kind: input, shape index: {}]   ;;  %s2336_s5 = inlined_call_operand.hbm [shape: f32[128,128], index: 5, kind: input, shape index: {}]   ;;  %s2337_s6 = inlined_call_operand.vmem [shape: f32[1,128], index: 6, kind: input, shape index: {}]   ;;  %s2338_s7 = inlined_call_operand.hbm [shape: f32[256,128], index: 7, kind: output, shape index: {}]  }
   0x1   :  { %14 = vsyncpa [#allocation3 + $0x1], 0 }
   0x2   :  { %15 = vsyncpa [#allocation6], 0 }
   0x3   :  { %16 = vsyncpa [#allocation9], 0 }
   0x4   :  { %17 = vsyncpa [#allocation4], 0 }
   0x5   :  { %19 = vsyncpa [#allocation4 + $0x1], 0  ;;  %s1909_s24 = smov 0   ;;  %s1911_s25 = smov 0  }
   0x6   :  { %s1913_s26 = smov 0   ;;  %s1915_s27 = smov 0  }
   0x7 LB: > { %s1930_s28 = sadd.s32 4294967295, %s1858_s27   ;;  %s1100_s29 = sadd.s32 4294967294, %s1858_s27   ;;  %s1858_s27 = sphi %s1915_s27, %s2363_s27   ;;  %s1854_s26 = sphi %s1913_s26, %s2362_s26   ;;  %s1850_s25 = sphi %s1911_s25, %s2361_s25   ;;  %s1846_s24 = sphi %s1909_s24, %s2360_s24  }
   0x8   : > { %p45_p0 = scmp.ne.s32.totalorder %s1850_s25, %s1846_s24  ;;  %p2339_p1 = scmp.eq.s32.totalorder %s1930_s28, 0 }
   0x9   : > { %p201_p3 = scmp.eq.s32.totalorder %s1100_s29, 3  ;;  %p1101_p5 = scmp.ge.s32.totalorder %s1858_s27, 1 }
   0xa   : > { %p1939_p4 = por %p2339_p1, %p45_p0  ;;  %p208_p7 = scmp.lt.s32.totalorder %s1858_s27, 5 }
   0xb   : > { %p1944_p6 = por %p201_p3, %p45_p0  ;;  %s1860_s10 = smov [#allocation5]  }
   0xc   : > { %s2343_s30 = scalar_select %p1939_p4, 1, 0 }
   0xd   : > { %s2344_s8 = scalar_select %p1944_p6, 1, 0 }
   0xe   : > { %p1949_p8 = pnand %p1101_p5, %p208_p7  ;;  %s220_s11 = sshll.u32 %s1860_s10, 4  ;;  %s1953_s11 = int_to_ptr.vmem [resolvable:$true] %s220_s11 }
   0xf   : > { %2345 = sst [smem:[#allocation15_spill]] %s2344_s8  ;;  %s1861_s13 = smov [#allocation7]  }
  0x10   : > { %s2346_s9 = scalar_select %p1949_p8, 1, 0 }
  0x11   : > { %p1541_p9 = pneg %p1949_p8  ;;  %s236_s14 = sshll.u32 %s1861_s13, 4  ;;  %s1963_s14 = int_to_ptr.vmem [resolvable:$true] %s236_s14 }
  0x12   : > { %s1862_s15 = smov [#allocation8]   ;;  %s1670_s19 = scalar_lea.hbm %s2332_s1, 2048 }
  0x13   : > { %p1959_p10 = pnand %p1541_p9, %p2339_p1  ;;  %s1965_s16 = sshll.u32 %s1862_s15, 4  ;;  %s253_s16 = int_to_ptr.vmem [resolvable:$true] %s1965_s16 }
  0x14   : > { %p1671_p11 = scmp.ne.s32.totalorder %s2332_s1, %s1670_s19  ;;  %p1677_p3 = scmp.lt.u32.totalorder %s1670_s19, %s2332_s1 }
  0x15   : > { %p1975_p12 = pneg %p1959_p10 }
  0x17   : > { %p1673_p13 = pnand %p1975_p12, %p1671_p11 }
  0x19   : > { %p1674_p0 = pneg %p1673_p13 }
  0x1b   : > { %p1679_p5 = pnand %p1677_p3, %p1674_p0 }
  0x1d   : > { %1682 = shalt.err (!%p1679_p5)
}
  0x1e   : > { %s1683_s10 = scalar_lea.vmem %s1953_s11, 2048  ;;  %p1691_p2 = scmp.lt.s32.totalorder %s1953_s11, %s1953_s11 }
  0x1f   : > { %p1684_p7 = scmp.ne.s32.totalorder %s1953_s11, %s1683_s10  ;;  %p1692_p6 = scmp.lt.s32.totalorder %s1683_s10, %s1683_s10 }
  0x21   : > { %p1686_p9 = pnand %p1684_p7, %p1975_p12  ;;  %p1693_p11 = por %p1692_p6, %p1691_p2 }
  0x23   : > { %p1687_p1 = pneg %p1686_p9 }
  0x25   : > { %p1694_p13 = pnand %p1693_p11, %p1687_p1 }
  0x27   : > { %1697 = shalt.err (!%p1694_p13)
}
  0x28   : > { %s1863_s13 = smov 128   ;;  %s1864_s15 = smov 8  }
  0x29   : > { %1544 = dma.hbm_to_vmem [thread:$0]  (!%p1959_p10), %s2332_s1, 2048, %s1953_s11, [#allocation6], %s1863_s13, %s1863_s13, %s1864_s15  }
  0x2a   : > { %s1698_s21 = scalar_lea.hbm %s2334_s3, 2048 }
  0x2b   : > { %p1699_p1 = scmp.ne.s32.totalorder %s2334_s3, %s1698_s21  ;;  %p1705_p0 = scmp.lt.u32.totalorder %s1698_s21, %s2334_s3 }
  0x2d   : > { %p1701_p2 = pnand %p1699_p1, %p1975_p12 }
  0x2f   : > { %p1702_p6 = pneg %p1701_p2 }
  0x31   : > { %p1707_p3 = pnand %p1705_p0, %p1702_p6 }
  0x33   : > { %1710 = shalt.err (!%p1707_p3)
}
  0x34   : > { %s1711_s11 = scalar_lea.vmem %s1963_s14, 2048  ;;  %p1719_p11 = scmp.lt.s32.totalorder %s1963_s14, %s1963_s14 }
  0x35   : > { %p1712_p5 = scmp.ne.s32.totalorder %s1963_s14, %s1711_s11  ;;  %p1720_p13 = scmp.lt.s32.totalorder %s1711_s11, %s1711_s11 }
  0x37   : > { %p1714_p7 = pnand %p1712_p5, %p1975_p12  ;;  %p1721_p1 = por %p1720_p13, %p1719_p11 }
  0x39   : > { %p1715_p9 = pneg %p1714_p7 }
  0x3b   : > { %p1722_p2 = pnand %p1721_p1, %p1715_p9 }
  0x3d   : > { %1725 = shalt.err (!%p1722_p2)
}
  0x3e   : > { %1547 = dma.hbm_to_vmem [thread:$0]  (!%p1959_p10), %s2334_s3, 2048, %s1963_s14, [#allocation6], %s1863_s13, %s1863_s13, %s1864_s15  }
  0x3f   : > { %s1726_s20 = scalar_lea.hbm %s2336_s5, 2048 }
  0x40   : > { %p1727_p6 = scmp.ne.s32.totalorder %s2336_s5, %s1726_s20  ;;  %p1733_p5 = scmp.lt.u32.totalorder %s1726_s20, %s2336_s5 }
  0x42   : > { %p1729_p0 = pnand %p1727_p6, %p1975_p12 }
  0x44   : > { %p1730_p3 = pneg %p1729_p0 }
  0x46   : > { %p1735_p7 = pnand %p1733_p5, %p1730_p3 }
  0x48   : > { %1738 = shalt.err (!%p1735_p7)
}
  0x49   : > { %s1739_s11 = scalar_lea.vmem %s253_s16, 2048  ;;  %p1747_p1 = scmp.lt.s32.totalorder %s253_s16, %s253_s16 }
  0x4a   : > { %p1740_p9 = scmp.ne.s32.totalorder %s253_s16, %s1739_s11  ;;  %p1748_p2 = scmp.lt.s32.totalorder %s1739_s11, %s1739_s11 }
  0x4c   : > { %p1742_p11 = pnand %p1740_p9, %p1975_p12  ;;  %p1749_p4 = por %p1748_p2, %p1747_p1 }
  0x4e   : > { %p1743_p13 = pneg %p1742_p11 }
  0x50   : > { %p1750_p8 = pnand %p1749_p4, %p1743_p13 }
  0x52   : > { %1753 = shalt.err (!%p1750_p8)
}
  0x53   : > { %1550 = dma.hbm_to_vmem [thread:$0]  (!%p1959_p10), %s2336_s5, 2048, %s253_s16, [#allocation9], %s1863_s13, %s1863_s13, %s1864_s15  }
  0x54   : > { %s2048_s22 = sadd.s32 1, %s1858_s27   ;;  %s32_s17 = sadd.s32 1, %s1854_s26 }
  0x55   : > { %s29_s12 = ssub.s32 %s1858_s27, %s2048_s22  ;;  %p39_p8 = scmp.ne.s32.totalorder %s1854_s26, %s1850_s25 }
  0x56   : > { %p30_p4 = scmp.eq.s32.totalorder %s29_s12, 0  ;;  %p40_p12 = scmp.eq.s32.totalorder %s1858_s27, 0 }
  0x57   : > { %p1562_p6 = scmp.lt.s32.totalorder %s1858_s27, 4  ;;  %p2349_p3 = scmp.eq.s32.totalorder %s1930_s28, 3 }
  0x58   : > { %s2058_s18 = scalar_select %p30_p4, %s1854_s26, %s32_s17  }
  0x59   : > { %p41_p0 = por %p40_p12, %p39_p8  ;;  %p2062_p5 = por %p2349_p3, %p39_p8 }
  0x5a   : > { %s269_s20 = sand.u32 1, %s1854_s26   ;;  %s1123_s21 = sshll.u32 %s1858_s27, 10 }
  0x5b   : > { %s1106_s16 = sshll.u32 %s269_s20, 6  ;;  %s2071_s10 = scalar_lea.hbm %s2331_s0, %s1123_s21 }
  0x5c   : > { %s273_s11 = scalar_lea.vmem [#allocation2], %s1106_s16  ;;  %p2073_p10 = pnand %p1562_p6, %p41_p0 }
  0x5d   : > { %s280_s14 = sshll.u32 %s273_s11, 4  ;;  %s2079_s12 = scalar_lea.sflag [#allocation3], %s269_s20  ;;  %s2077_s14 = int_to_ptr.vmem [resolvable:$true] %s280_s14 }
  0x5e   : > { %s1754_s17 = scalar_lea.hbm %s2071_s10, 1024  ;;  %p1756_p9 = pneg %p2073_p10 }
  0x5f   : > { %p1755_p7 = scmp.ne.s32.totalorder %s2071_s10, %s1754_s17  ;;  %s1759_s23 = scalar_lea.hbm %s2331_s0, 4096 }
  0x60   : > { %p1760_p1 = scmp.lt.u32.totalorder %s2071_s10, %s2331_s0  ;;  %p1761_p2 = scmp.lt.u32.totalorder %s1759_s23, %s1754_s17 }
  0x61   : > { %p1757_p11 = pnand %p1756_p9, %p1755_p7  ;;  %p1763_p8 = scmp.lt.u32.totalorder %s1754_s17, %s2071_s10 }
  0x62   : > { %p1762_p4 = por %p1761_p2, %p1760_p1 }
  0x63   : > { %p1758_p13 = pneg %p1757_p11 }
  0x64   : > { %p1764_p12 = por %p1763_p8, %p1762_p4 }
  0x66   : > { %p1765_p6 = pnand %p1764_p12, %p1758_p13 }
  0x68   : > { %1768 = shalt.err (!%p1765_p6)
}
  0x69   : > { %s1769_s20 = scalar_lea.vmem %s2077_s14, 1024  ;;  %s1865_s21 = smov [#allocation2]  }
  0x6a   : > { %p1770_p0 = scmp.ne.s32.totalorder %s2077_s14, %s1769_s20  ;;  %s1774_s16 = sshll.u32 %s1865_s21, 4  ;;  %s1775_s16 = int_to_ptr.vmem [resolvable:$false] %s1774_s16 }
  0x6b   : > { %s1776_s29 = scalar_lea.vmem %s1775_s16, 2048  ;;  %p1777_p11 = scmp.lt.s32.totalorder %s2077_s14, %s1775_s16 }
  0x6c   : > { %p1772_p3 = pnand %p1770_p0, %p1756_p9  ;;  %p1778_p1 = scmp.lt.s32.totalorder %s1776_s29, %s1769_s20 }
  0x6e   : > { %p1773_p7 = pneg %p1772_p3  ;;  %p1779_p2 = por %p1778_p1, %p1777_p11 }
  0x70   : > { %p1780_p4 = pnand %p1779_p2, %p1773_p7 }
  0x72   : > { %1783 = shalt.err (!%p1780_p4)
}
  0x73   : > { %1554 = dma.hbm_to_vmem [thread:$0]  (!%p2073_p10), %s2071_s10, 1024, %s2077_s14, %s2079_s12, %s1863_s13, %s1863_s13, %s1864_s15  }
  0x74   : > { %p2352_p9 = scmp.ne.s32.totalorder %s2346_s9, 0 }
  0x75   : > { %s2113_s17 = sand.u32 (!%p2352_p9), 1, %s1850_s25   ;;  %p2353_p13 = scmp.ne.s32.totalorder (!%p2352_p9), %s2343_s30, 0 }
  0x76   : > { %292 = sbr.rel (%p2352_p9) target bundleno = 1116 (0x45c), region = 48  ;;  %s1110_s23 = sshll.u32 (!%p2352_p9), %s2113_s17, 6 }
  0x77   : > { %s295_s11 = scalar_lea.sflag (!%p2352_p9), [#allocation3], %s2113_s17  ;;  %s2119_s8 = scalar_lea.vmem (!%p2352_p9), [#allocation2], %s1110_s23 }
  0x7d   : > { %1829 = dma.done.wait (%p2353_p13), %s295_s11, 1024  }
  0x7e   : > { %1831 = vsyncadd (%p2353_p13), %s295_s11, 4294966272  ;;  %p2354_p10 = scmp.eq.s32.totalorder %s1930_s28, 0 }
  0x80   : > { %1833 = dma.done.wait (%p2354_p10), [#allocation6], 4096   ;;  %p2355_p8 = pmov %p2354_p10 }
  0x82   : > { %1835 = vsyncadd (%p2355_p8), [#allocation6], 4294963200  ;;  %p2356_p12 = pmov %p2355_p8 }
  0x83   : > { %p2357_p6 = pmov %p2355_p8 }
  0x84   : > { %1837 = dma.done.wait (%p2356_p12), [#allocation9], 2048  }
  0x85   : > { %1839 = vsyncadd (%p2357_p6), [#allocation9], 4294965248  ;;  %v351_v0 = vld [vmem:[#allocation5] sm:$0xff]  ;;  %v352_v1 = vld [vmem:[#allocation5 + $0x8] sm:$0xff]  ;;  %s340_s12 = scalar_lea.vmem [#allocation10], %s1110_s23  ;;  %s1124_s20 = sshll.u32 %s1930_s28, 10 }
  0x86   : > { %v353_v2 = vld [vmem:[#allocation5 + $0x10] sm:$0xff]  ;;  %v1397_v3 = vpack.c.bf16 %v352_v1, %v351_v0  ;;  %v354_v4 = vld [vmem:[#allocation5 + $0x18] sm:$0xff]  ;;  %v355_v6 = vld [vmem:[#allocation5 + $0x20] sm:$0xff]  ;;  %s998_s21 = sshll.u32 %s340_s12, 4  ;;  %s2286_s23 = scalar_lea.hbm %s2338_s7, %s1124_s20  ;;  %s2288_s21 = int_to_ptr.vmem [resolvable:$true] %s998_s21 }
  0x87   : > { %v1401_v5 = vpack.c.bf16 %v354_v4, %v353_v2  ;;  %v356_v7 = vld [vmem:[#allocation5 + $0x28] sm:$0xff]  ;;  %v2134_v9 = vld [vmem:[%s2119_s8] sm:$0xff]  ;;  %v357_v10 = vld [vmem:[#allocation5 + $0x30] sm:$0xff]  ;;  %s985_s28 = scalar_lea.sflag [#allocation4], %s2113_s17  ;;  %s1784_s11 = scalar_lea.vmem %s2288_s21, 1024 }
  0x88   : > { %1398 = vmatprep.subr.bf16.mxu0 %v1397_v3  ;;  %v1405_v8 = vpack.c.bf16 %v356_v7, %v355_v6  ;;  %v358_v11 = vld [vmem:[#allocation5 + $0x38] sm:$0xff]  ;;  %1253 = vmatprep.mubr.f32.mxu0 %v2134_v9  ;;  %v367_v12 = vld [vmem:[#allocation7] sm:$0xff]  ;;  %v368_v13 = vld [vmem:[#allocation7 + $0x8] sm:$0xff]  ;;  %p1785_p0 = scmp.ne.s32.totalorder %s2288_s21, %s1784_s11 }
  0x89   : > { %1400 = vmatpush3.bf16.msra.mxu0 %v1397_v3  ;;  %v369_v14 = vld [vmem:[#allocation7 + $0x10] sm:$0xff]  ;;  %v1409_v15 = vpack.c.bf16 %v358_v11, %v357_v10  ;;  %v359_v16 = vld [vmem:[#allocation5 + $0x40] sm:$0xff]  ;;  %v1429_v17 = vpack.c.bf16 %v368_v13, %v367_v12  ;;  %v370_v18 = vld [vmem:[#allocation7 + $0x18] sm:$0xff] }
  0x8a   : > { %1402 = vmatprep.subr.bf16.mxu0 %v1401_v5  ;;  %v360_v19 = vld [vmem:[#allocation5 + $0x48] sm:$0xff]  ;;  %v1433_v20 = vpack.c.bf16 %v370_v18, %v369_v14  ;;  %v371_v21 = vld [vmem:[#allocation7 + $0x20] sm:$0xff]  ;;  %v361_v25 = vld [vmem:[#allocation5 + $0x50] sm:$0xff]  ;;  %p1786_p3 = pnand %p1785_p0, %p2062_p5 }
  0x8b   : > { %v372_v22 = vld [vmem:[#allocation7 + $0x28] sm:$0xff]  ;;  %1430 = vmatprep.subr.bf16.mxu1 %v1429_v17  ;;  %v1413_v23 = vpack.c.bf16 %v360_v19, %v359_v16  ;;  %v362_v26 = vld [vmem:[#allocation5 + $0x58] sm:$0xff]  ;;  %v363_v28 = vld [vmem:[#allocation5 + $0x60] sm:$0xff] }
  0x8c   : > { %1432 = vmatpush3.bf16.msra.mxu1 %v1429_v17  ;;  %v1437_v24 = vpack.c.bf16 %v372_v22, %v371_v21  ;;  %v1417_v27 = vpack.c.bf16 %v362_v26, %v361_v25  ;;  %v364_v29 = vld [vmem:[#allocation5 + $0x68] sm:$0xff]  ;;  %v365_v31 = vld [vmem:[#allocation5 + $0x70] sm:$0xff]  ;;  %v366_v32 = vld [vmem:[#allocation5 + $0x78] sm:$0xff]  ;;  %p1787_p7 = pneg %p1786_p3 }
  0x8d   : > { %1404 = vmatpush3.bf16.msra.mxu0 %v1401_v5  ;;  %1434 = vmatprep.subr.bf16.mxu1 %v1433_v20  ;;  %v1421_v30 = vpack.c.bf16 %v364_v29, %v363_v28  ;;  %v1425_v33 = vpack.c.bf16 %v366_v32, %v365_v31  ;;  %v2138_v34 = vld [vmem:[%s2119_s8 + $0x8] sm:$0xff]  ;;  %v2141_v35 = vld [vmem:[%s2119_s8 + $0x10] sm:$0xff]  ;;  %v2146_v36 = vld [vmem:[%s2119_s8 + $0x18] sm:$0xff] }
  0x8e   : > { %1406 = vmatprep.subr.bf16.mxu0 %v1405_v8  ;;  %v2149_v37 = vld [vmem:[%s2119_s8 + $0x20] sm:$0xff]  ;;  %v2154_v38 = vld [vmem:[%s2119_s8 + $0x28] sm:$0xff]  ;;  %v2157_v39 = vld [vmem:[%s2119_s8 + $0x30] sm:$0xff] }
  0x8f   : > { %v2162_v40 = vld [vmem:[%s2119_s8 + $0x38] sm:$0xff]  ;;  %v373_v41 = vld [vmem:[#allocation7 + $0x30] sm:$0xff]  ;;  %v375_v44 = vld [vmem:[#allocation7 + $0x40] sm:$0xff]  ;;  %s1866_s8 = smov [#allocation10]  }
  0x90   : > { %1436 = vmatpush3.bf16.msra.mxu1 %v1433_v20  ;;  %v374_v42 = vld [vmem:[#allocation7 + $0x38] sm:$0xff]  ;;  %v376_v45 = vld [vmem:[#allocation7 + $0x48] sm:$0xff]  ;;  %v377_v47 = vld [vmem:[#allocation7 + $0x50] sm:$0xff]  ;;  %s1788_s30 = sshll.u32 %s1866_s8, 4  ;;  %s1789_s30 = int_to_ptr.vmem [resolvable:$false] %s1788_s30 }
  0x91   : > { %1408 = vmatpush3.bf16.msra.mxu0 %v1405_v8  ;;  %1438 = vmatprep.subr.bf16.mxu1 %v1437_v24  ;;  %v1441_v43 = vpack.c.bf16 %v374_v42, %v373_v41  ;;  %v1445_v46 = vpack.c.bf16 %v376_v45, %v375_v44  ;;  %v378_v48 = vld [vmem:[#allocation7 + $0x58] sm:$0xff]  ;;  %v379_v50 = vld [vmem:[#allocation7 + $0x60] sm:$0xff]  ;;  %v380_v51 = vld [vmem:[#allocation7 + $0x68] sm:$0xff]  ;;  %s1790_s9 = scalar_lea.vmem %s1789_s30, 2048  ;;  %p1791_p11 = scmp.lt.s32.totalorder %s2288_s21, %s1789_s30 }
  0x92   : > { %1410 = vmatprep.subr.bf16.mxu0 %v1409_v15  ;;  %v1449_v49 = vpack.c.bf16 %v378_v48, %v377_v47  ;;  %v1453_v52 = vpack.c.bf16 %v380_v51, %v379_v50  ;;  %v381_v53 = vld [vmem:[#allocation7 + $0x70] sm:$0xff]  ;;  %v382_v54 = vld [vmem:[#allocation7 + $0x78] sm:$0xff]  ;;  %v1115_v56 = vld [vmem:[%s2333_s2] ss:$0 sm:$0xff]  ;;  %p1792_p1 = scmp.lt.s32.totalorder %s1790_s9, %s1784_s11 }
  0x93   : > { %v1457_v55 = vpack.c.bf16 %v382_v54, %v381_v53  ;;  %v383_v41 = vld [vmem:[#allocation8] sm:$0xff]  ;;  %v384_v42 = vld [vmem:[#allocation8 + $0x8] sm:$0xff]  ;;  %v386_v45 = vld [vmem:[#allocation8 + $0x18] sm:$0xff] }
  0x94   : > { %1440 = vmatpush3.bf16.msra.mxu1 %v1437_v24  ;;  %v1493_v44 = vpack.c.bf16 %v384_v42, %v383_v41  ;;  %v387_v47 = vld [vmem:[#allocation8 + $0x20] sm:$0xff]  ;;  %v388_v48 = vld [vmem:[#allocation8 + $0x28] sm:$0xff]  ;;  %v389_v50 = vld [vmem:[#allocation8 + $0x30] sm:$0xff]  ;;  %p1793_p2 = por %p1792_p1, %p1791_p11 }
  0x95   : > { %1412 = vmatpush3.bf16.msra.mxu0 %v1409_v15  ;;  %1442 = vmatprep.subr.bf16.mxu1 %v1441_v43  ;;  %v390_v51 = vld [vmem:[#allocation8 + $0x38] sm:$0xff]  ;;  %v2203_v53 = vld [vmem:[%s2335_s4] ss:$0 sm:$0xff] }
  0x96   : > { %1414 = vmatprep.subr.bf16.mxu0 %v1413_v23  ;;  %p1794_p4 = pnand %p1793_p2, %p1787_p7 }
  0x98   : > { %1444 = vmatpush3.bf16.msra.mxu1 %v1441_v43 }
  0x99   : > { %1416 = vmatpush3.bf16.msra.mxu0 %v1413_v23  ;;  %1446 = vmatprep.subr.bf16.mxu1 %v1445_v46 }
  0x9a   : > { %1418 = vmatprep.subr.bf16.mxu0 %v1417_v27 }
  0x9c   : > { %1448 = vmatpush3.bf16.msra.mxu1 %v1445_v46 }
  0x9d   : > { %1420 = vmatpush3.bf16.msra.mxu0 %v1417_v27  ;;  %1450 = vmatprep.subr.bf16.mxu1 %v1449_v49 }
  0x9e   : > { %1422 = vmatprep.subr.bf16.mxu0 %v1421_v30 }
  0xa0   : > { %1452 = vmatpush3.bf16.msra.mxu1 %v1449_v49 }
  0xa1   : > { %1424 = vmatpush3.bf16.msra.mxu0 %v1421_v30  ;;  %1454 = vmatprep.subr.bf16.mxu1 %v1453_v52 }
  0xa2   : > { %1426 = vmatprep.subr.bf16.mxu0 %v1425_v33 }
  0xa4   : > { %1456 = vmatpush3.bf16.msra.mxu1 %v1453_v52 }
  0xa5   : > { %1428 = vmatpush3.bf16.msra.mxu0 %v1425_v33  ;;  %1458 = vmatprep.subr.bf16.mxu1 %v1457_v55 }
  0xa6   : > { %1462 = vmatprep.subr.bf16.mxu0 %v1429_v17 }
  0xa8   : > { %1254 = vmatmul.mubr.f32.vlgmr.msra.gmra.mrb[0].mxu0 %v2138_v34  ;;  %1460 = vmatpush3.bf16.msra.mxu1 %v1457_v55 }
  0xa9   : > { %1256 = vmatprep.mubr.f32.mxu0 %v2141_v35  ;;  %1464 = vmatpush3.bf16.msra.mxu0 %v1429_v17 }
  0xaa   : > { %1466 = vmatprep.subr.bf16.mxu0 %v1433_v20  ;;  %1494 = vmatprep.subr.bf16.mxu1 %v1493_v44 }
  0xac   : > { %1257 = vmatmul.mubr.f32.gmra.mrb[2].mxu0 %v2146_v36 }
  0xad   : > { %1259 = vmatprep.mubr.f32.mxu0 %v2149_v37  ;;  %1468 = vmatpush3.bf16.msra.mxu0 %v1433_v20 }
  0xae   : > { %1470 = vmatprep.subr.bf16.mxu0 %v1437_v24 }
  0xb0   : > { %1260 = vmatmul.mubr.f32.gmra.mrb[4].mxu0 %v2154_v38 }
  0xb1   : > { %1262 = vmatprep.mubr.f32.mxu0 %v2157_v39  ;;  %1472 = vmatpush3.bf16.msra.mxu0 %v1437_v24 }
  0xb2   : > { %1474 = vmatprep.subr.bf16.mxu0 %v1441_v43 }
  0xb4   : > { %1263 = vmatmul.mubr.f32.gmra.mrb[6].mxu0 %v2162_v40 }
  0xb5   : > { %1476 = vmatpush3.bf16.msra.mxu0 %v1441_v43  ;;  %v385_v43 = vld [vmem:[#allocation8 + $0x10] sm:$0xff] }
  0xb6   : > { %1478 = vmatprep.subr.bf16.mxu0 %v1445_v46 }
  0xb9   : > { %1480 = vmatpush3.bf16.msra.mxu0 %v1445_v46  ;;  %v1497_v46 = vpack.c.bf16 %v386_v45, %v385_v43 }
  0xba   : > { %1482 = vmatprep.subr.bf16.mxu0 %v1449_v49 }
  0xbd   : > { %1484 = vmatpush3.bf16.msra.mxu0 %v1449_v49  ;;  %v1501_v49 = vpack.c.bf16 %v388_v48, %v387_v47 }
  0xbe   : > { %1486 = vmatprep.subr.bf16.mxu0 %v1453_v52 }
  0xc1   : > { %1488 = vmatpush3.bf16.msra.mxu0 %v1453_v52  ;;  %v1505_v52 = vpack.c.bf16 %v390_v51, %v389_v50 }
  0xc2   : > { %1490 = vmatprep.subr.bf16.mxu0 %v1457_v55 }
  0xc5   : > { %1492 = vmatpush3.bf16.msra.mxu0 %v1457_v55 }
 0x17b   : > { %v1255_v57 = vpop.f32.mrb[0].mxu0 }
 0x17c   : > { %v492_v58 = vadd.f32 %v1255_v57, %v1115_v56  ;;  %v486_v59 = vpop.f32.mrb[1].mxu0 }
 0x17d   : > { %v487_v60 = vadd.f32 %v1115_v56, %v486_v59 }
 0x17e   : > { %1606 = vtanh.f32 %v492_v58 }
 0x17f   : > { %1608 = vtanh.f32 %v487_v60  ;;  %v1258_v61 = vpop.f32.mrb[2].mxu0 }
 0x180   : > { %v502_v62 = vadd.f32 %v1258_v61, %v1115_v56  ;;  %v496_v63 = vpop.f32.mrb[3].mxu0 }
 0x181   : > { %v497_v0 = vadd.f32 %v1115_v56, %v496_v63 }
 0x182   : > { %1610 = vtanh.f32 %v502_v62 }
 0x183   : > { %1612 = vtanh.f32 %v497_v0  ;;  %v1261_v1 = vpop.f32.mrb[4].mxu0 }
 0x184   : > { %v512_v2 = vadd.f32 %v1261_v1, %v1115_v56  ;;  %v506_v3 = vpop.f32.mrb[5].mxu0 }
 0x185   : > { %v507_v4 = vadd.f32 %v1115_v56, %v506_v3 }
 0x186   : > { %1614 = vtanh.f32 %v512_v2 }
 0x187   : > { %1616 = vtanh.f32 %v507_v4  ;;  %v1264_v5 = vpop.f32.mrb[6].mxu0 }
 0x188   : > { %v2168_v6 = vpop.eup %1606  ;;  %v522_v7 = vadd.f32 %v1264_v5, %v1115_v56  ;;  %v516_v8 = vpop.f32.mrb[7].mxu0 }
 0x189   : > { %v2170_v10 = vpop.eup %1608  ;;  %v517_v11 = vadd.f32 %v1115_v56, %v516_v8  ;;  %v550_v12 = vmul.f32 0.5, %v2168_v6  ;;  %v534_v63 = vmul.f32 0.16666667, %v2168_v6 }
 0x18a   : > { %1618 = vtanh.f32 %v522_v7  ;;  %v549_v13 = vmul.f32 0.5, %v2170_v10  ;;  %v533_v0 = vmul.f32 0.16666667, %v2170_v10 }
 0x18b   : > { %1620 = vtanh.f32 %v517_v11  ;;  %v558_v17 = vadd.f32 %v550_v12, %v2138_v34  ;;  %v542_v11 = vadd.f32 %v534_v63, %v2138_v34 }
 0x18c   : > { %v2174_v14 = vpop.eup %1610  ;;  %v557_v15 = vadd.f32 %v549_v13, %v2134_v9  ;;  %v541_v12 = vadd.f32 %v533_v0, %v2134_v9 }
 0x18d   : > { %v2177_v16 = vpop.eup %1612  ;;  %v552_v18 = vmul.f32 0.5, %v2174_v14  ;;  %v536_v6 = vmul.f32 0.16666667, %v2174_v14 }
 0x18e   : > { %1297 = vmatprep.mubr.f32.mxu1 %v557_v15  ;;  %v551_v19 = vmul.f32 0.5, %v2177_v16 }
 0x18f   : > { %1298 = vmatmul.mubr.f32.vlgmr.msra.gmra.mrb[0].mxu1 %v558_v17  ;;  %v560_v23 = vadd.f32 %v552_v18, %v2146_v36  ;;  %v535_v18 = vmul.f32 0.16666667, %v2177_v16 }
 0x190   : > { %v2182_v20 = vpop.eup %1614  ;;  %v559_v21 = vadd.f32 %v551_v19, %v2141_v35  ;;  %1496 = vmatpush3.bf16.msra.mxu1 %v1493_v44 }
 0x191   : > { %v2185_v22 = vpop.eup %1616  ;;  %v554_v24 = vmul.f32 0.5, %v2182_v20  ;;  %1498 = vmatprep.subr.bf16.mxu1 %v1497_v46  ;;  %v543_v42 = vadd.f32 %v535_v18, %v2141_v35 }
 0x192   : > { %1300 = vmatprep.mubr.f32.mxu1 %v559_v21  ;;  %v553_v25 = vmul.f32 0.5, %v2185_v22 }
 0x193   : > { %1301 = vmatmul.mubr.f32.gmra.mrb[2].mxu1 %v560_v23  ;;  %v562_v29 = vadd.f32 %v554_v24, %v2154_v38 }
 0x194   : > { %v2190_v26 = vpop.eup %1618  ;;  %v561_v27 = vadd.f32 %v553_v25, %v2149_v37  ;;  %1500 = vmatpush3.bf16.msra.mxu1 %v1497_v46  ;;  %v538_v25 = vmul.f32 0.16666667, %v2182_v20 }
 0x195   : > { %v2193_v28 = vpop.eup %1620  ;;  %v556_v30 = vmul.f32 0.5, %v2190_v26  ;;  %1502 = vmatprep.subr.bf16.mxu1 %v1501_v49 }
 0x196   : > { %1303 = vmatprep.mubr.f32.mxu1 %v561_v27  ;;  %v555_v31 = vmul.f32 0.5, %v2193_v28  ;;  %v546_v47 = vadd.f32 %v538_v25, %v2154_v38 }
 0x197   : > { %1304 = vmatmul.mubr.f32.gmra.mrb[4].mxu1 %v562_v29  ;;  %v564_v33 = vadd.f32 %v556_v30, %v2162_v40 }
 0x198   : > { %v563_v32 = vadd.f32 %v555_v31, %v2157_v39  ;;  %1504 = vmatpush3.bf16.msra.mxu1 %v1501_v49  ;;  %v540_v49 = vmul.f32 0.16666667, %v2190_v26 }
 0x199   : > { %1506 = vmatprep.subr.bf16.mxu1 %v1505_v52 }
 0x19a   : > { %1306 = vmatprep.mubr.f32.mxu1 %v563_v32  ;;  %v544_v32 = vadd.f32 %v536_v6, %v2146_v36  ;;  %v548_v63 = vadd.f32 %v540_v49, %v2162_v40  ;;  %v394_v6 = vld [vmem:[#allocation8 + $0x58] sm:$0xff] }
 0x19b   : > { %1307 = vmatmul.mubr.f32.gmra.mrb[6].mxu1 %v564_v33  ;;  %v537_v33 = vmul.f32 0.16666667, %v2185_v22 }
 0x19c   : > { %1508 = vmatpush3.bf16.msra.mxu1 %v1505_v52  ;;  %v539_v52 = vmul.f32 0.16666667, %v2193_v28 }
 0x262   : > { %v1299_v54 = vpop.f32.mrb[0].mxu1 }
 0x263   : > { %v637_v55 = vadd.f32 %v1299_v54, %v2203_v53  ;;  %v631_v56 = vpop.f32.mrb[1].mxu1 }
 0x264   : > { %v632_v57 = vadd.f32 %v2203_v53, %v631_v56 }
 0x265   : > { %1622 = vtanh.f32 %v637_v55  ;;  %v545_v55 = vadd.f32 %v537_v33, %v2149_v37 }
 0x266   : > { %1624 = vtanh.f32 %v632_v57  ;;  %v1302_v58 = vpop.f32.mrb[2].mxu1 }
 0x267   : > { %v647_v59 = vadd.f32 %v1302_v58, %v2203_v53  ;;  %v641_v60 = vpop.f32.mrb[3].mxu1 }
 0x268   : > { %v642_v61 = vadd.f32 %v2203_v53, %v641_v60 }
 0x269   : > { %1626 = vtanh.f32 %v647_v59 }
 0x26a   : > { %1628 = vtanh.f32 %v642_v61  ;;  %v1305_v62 = vpop.f32.mrb[4].mxu1 }
 0x26b   : > { %v657_v1 = vadd.f32 %v1305_v62, %v2203_v53  ;;  %v651_v2 = vpop.f32.mrb[5].mxu1 }
 0x26c   : > { %v652_v3 = vadd.f32 %v2203_v53, %v651_v2 }
 0x26d   : > { %1630 = vtanh.f32 %v657_v1  ;;  %v547_v1 = vadd.f32 %v539_v52, %v2157_v39 }
 0x26e   : > { %1632 = vtanh.f32 %v652_v3  ;;  %v1308_v4 = vpop.f32.mrb[6].mxu1 }
 0x26f   : > { %v1623_v5 = vpop.eup %1622  ;;  %v667_v7 = vadd.f32 %v1308_v4, %v2203_v53  ;;  %v661_v8 = vpop.f32.mrb[7].mxu1 }
 0x270   : > { %v1625_v13 = vpop.eup %1624  ;;  %v695_v10 = vmul.f32 0.5, %v1623_v5  ;;  %v662_v15 = vadd.f32 %v2203_v53, %v661_v8  ;;  %v679_v17 = vmul.f32 0.33333334, %v1623_v5  ;;  %v391_v8 = vld [vmem:[#allocation8 + $0x40] sm:$0xff] }
 0x271   : > { %1634 = vtanh.f32 %v667_v7  ;;  %v694_v19 = vmul.f32 0.5, %v1625_v13  ;;  %v678_v21 = vmul.f32 0.33333334, %v1625_v13  ;;  %v393_v13 = vld [vmem:[#allocation8 + $0x50] sm:$0xff] }
 0x272   : > { %1636 = vtanh.f32 %v662_v15  ;;  %v2219_v23 = vadd.f32 %v679_v17, %v542_v11  ;;  %v703_v30 = vadd.f32 %v695_v10, %v2138_v34  ;;  %v392_v11 = vld [vmem:[#allocation8 + $0x48] sm:$0xff]  ;;  %v1513_v10 = vpack.c.bf16 %v394_v6, %v393_v13  ;;  %v395_v15 = vld [vmem:[#allocation8 + $0x60] sm:$0xff] }
 0x273   : > { %v1627_v24 = vpop.eup %1626  ;;  %v702_v27 = vadd.f32 %v694_v19, %v2134_v9  ;;  %v2223_v29 = vadd.f32 %v678_v21, %v541_v12  ;;  %v1509_v12 = vpack.c.bf16 %v392_v11, %v391_v8  ;;  %v396_v17 = vld [vmem:[#allocation8 + $0x68] sm:$0xff]  ;;  %v397_v19 = vld [vmem:[#allocation8 + $0x70] sm:$0xff]  ;;  %v398_v21 = vld [vmem:[#allocation8 + $0x78] sm:$0xff] }
 0x274   : > { %v1629_v14 = vpop.eup %1628  ;;  %v697_v31 = vmul.f32 0.5, %v1627_v24  ;;  %v681_v16 = vmul.f32 0.33333334, %v1627_v24  ;;  %v1517_v18 = vpack.c.bf16 %v396_v17, %v395_v15  ;;  %v1521_v24 = vpack.c.bf16 %v398_v21, %v397_v19 }
 0x275   : > { %1341 = vmatprep.mubr.f32.mxu0 %v702_v27  ;;  %v696_v41 = vmul.f32 0.5, %v1629_v14  ;;  %v680_v43 = vmul.f32 0.33333334, %v1629_v14  ;;  %1510 = vmatprep.subr.bf16.mxu1 %v1509_v12 }
 0x276   : > { %1342 = vmatmul.mubr.f32.vlgmr.msra.gmra.mrb[8].mxu0 %v703_v30  ;;  %v2229_v20 = vadd.f32 %v681_v16, %v544_v32  ;;  %v705_v22 = vadd.f32 %v697_v31, %v2146_v36  ;;  %1512 = vmatpush3.bf16.msra.mxu1 %v1509_v12 }
 0x277   : > { %v1631_v44 = vpop.eup %1630  ;;  %v704_v45 = vadd.f32 %v696_v41, %v2141_v35  ;;  %v2232_v46 = vadd.f32 %v680_v43, %v543_v42  ;;  %1514 = vmatprep.subr.bf16.mxu1 %v1513_v10 }
 0x278   : > { %v1633_v48 = vpop.eup %1632  ;;  %v699_v50 = vmul.f32 0.5, %v1631_v44  ;;  %v683_v51 = vmul.f32 0.33333334, %v1631_v44 }
 0x279   : > { %1344 = vmatprep.mubr.f32.mxu0 %v704_v45  ;;  %v698_v54 = vmul.f32 0.5, %v1633_v48  ;;  %v682_v56 = vmul.f32 0.33333334, %v1633_v48 }
 0x27a   : > { %1345 = vmatmul.mubr.f32.gmra.mrb[10].mxu0 %v705_v22  ;;  %v2239_v57 = vadd.f32 %v683_v51, %v546_v47  ;;  %v707_v61 = vadd.f32 %v699_v50, %v2154_v38  ;;  %1516 = vmatpush3.bf16.msra.mxu1 %v1513_v10 }
 0x27b   : > { %v1635_v58 = vpop.eup %1634  ;;  %v706_v59 = vadd.f32 %v698_v54, %v2149_v37  ;;  %v2242_v60 = vadd.f32 %v682_v56, %v545_v55  ;;  %1518 = vmatprep.subr.bf16.mxu1 %v1517_v18 }
 0x27c   : > { %v1637_v26 = vpop.eup %1636  ;;  %v701_v62 = vmul.f32 0.5, %v1635_v58  ;;  %v685_v28 = vmul.f32 0.33333334, %v1635_v58 }
 0x27d   : > { %1347 = vmatprep.mubr.f32.mxu0 %v706_v59  ;;  %v700_v0 = vmul.f32 0.5, %v1637_v26  ;;  %v684_v2 = vmul.f32 0.33333334, %v1637_v26 }
 0x27e   : > { %1348 = vmatmul.mubr.f32.gmra.mrb[12].mxu0 %v707_v61  ;;  %v2247_v3 = vadd.f32 %v685_v28, %v548_v63  ;;  %v709_v7 = vadd.f32 %v701_v62, %v2162_v40  ;;  %1520 = vmatpush3.bf16.msra.mxu1 %v1517_v18 }
 0x27f   : > { %v708_v4 = vadd.f32 %v700_v0, %v2157_v39  ;;  %v2250_v5 = vadd.f32 %v684_v2, %v547_v1  ;;  %1522 = vmatprep.subr.bf16.mxu1 %v1521_v24 }
 0x281   : > { %1350 = vmatprep.mubr.f32.mxu0 %v708_v4 }
 0x282   : > { %1351 = vmatmul.mubr.f32.gmra.mrb[14].mxu0 %v709_v7  ;;  %1524 = vmatpush3.bf16.msra.mxu1 %v1521_v24 }
 0x349   : > { %v1343_v25 = vpop.f32.mrb[8].mxu0 }
 0x34a   : > { %v782_v27 = vadd.f32 %v1343_v25, %v2203_v53  ;;  %v776_v14 = vpop.f32.mrb[9].mxu0 }
 0x34b   : > { %v777_v30 = vadd.f32 %v2203_v53, %v776_v14 }
 0x34c   : > { %1638 = vtanh.f32 %v782_v27 }
 0x34d   : > { %1640 = vtanh.f32 %v777_v30  ;;  %v1346_v31 = vpop.f32.mrb[10].mxu0 }
 0x34e   : > { %v792_v32 = vadd.f32 %v1346_v31, %v2203_v53  ;;  %v786_v16 = vpop.f32.mrb[11].mxu0 }
 0x34f   : > { %v787_v33 = vadd.f32 %v2203_v53, %v786_v16 }
 0x350   : > { %1642 = vtanh.f32 %v792_v32 }
 0x351   : > { %1644 = vtanh.f32 %v787_v33  ;;  %v1349_v41 = vpop.f32.mrb[12].mxu0 }
 0x352   : > { %v802_v42 = vadd.f32 %v1349_v41, %v2203_v53  ;;  %v796_v43 = vpop.f32.mrb[13].mxu0 }
 0x353   : > { %v797_v44 = vadd.f32 %v2203_v53, %v796_v43 }
 0x354   : > { %1646 = vtanh.f32 %v802_v42 }
 0x355   : > { %1648 = vtanh.f32 %v797_v44  ;;  %v1352_v45 = vpop.f32.mrb[14].mxu0 }
 0x356   : > { %v1639_v47 = vpop.eup %1638  ;;  %v812_v48 = vadd.f32 %v1352_v45, %v2203_v53  ;;  %v806_v49 = vpop.f32.mrb[15].mxu0 }
 0x357   : > { %v1641_v22 = vpop.eup %1640  ;;  %v807_v50 = vadd.f32 %v2203_v53, %v806_v49  ;;  %v824_v51 = vmul.f32 0.33333334, %v1639_v47  ;;  %v840_v55 = vadd.f32 %v1639_v47, %v2138_v34 }
 0x358   : > { %1650 = vtanh.f32 %v812_v48  ;;  %v839_v52 = vadd.f32 %v1641_v22, %v2134_v9  ;;  %v823_v54 = vmul.f32 0.33333334, %v1641_v22 }
 0x359   : > { %1652 = vtanh.f32 %v807_v50  ;;  %v832_v56 = vadd.f32 %v824_v51, %v2219_v23 }
 0x35a   : > { %v1643_v58 = vpop.eup %1642  ;;  %1385 = vmatprep.mubr.f32.mxu1 %v839_v52  ;;  %v831_v59 = vadd.f32 %v823_v54, %v2223_v29 }
 0x35b   : > { %v1645_v26 = vpop.eup %1644  ;;  %1386 = vmatmul.mubr.f32.vlgmr.msra.gmra.mrb[8].mxu1 %v840_v55  ;;  %v826_v61 = vmul.f32 0.33333334, %v1643_v58  ;;  %v842_v63 = vadd.f32 %v1643_v58, %v2146_v36 }
 0x35c   : > { %v841_v62 = vadd.f32 %v1645_v26, %v2141_v35  ;;  %v825_v53 = vmul.f32 0.33333334, %v1645_v26 }
 0x35d   : > { %v834_v9 = vadd.f32 %v826_v61, %v2229_v20 }
 0x35e   : > { %v1647_v28 = vpop.eup %1646  ;;  %1388 = vmatprep.mubr.f32.mxu1 %v841_v62  ;;  %v833_v34 = vadd.f32 %v825_v53, %v2232_v46 }
 0x35f   : > { %v1649_v0 = vpop.eup %1648  ;;  %1389 = vmatmul.mubr.f32.gmra.mrb[10].mxu1 %v842_v63  ;;  %v828_v23 = vmul.f32 0.33333334, %v1647_v28  ;;  %v844_v2 = vadd.f32 %v1647_v28, %v2154_v38  ;;  %v1117_v38 = vld [vmem:[%s2337_s6] ss:$0 sm:$0xff] }
 0x360   : > { %v843_v1 = vadd.f32 %v1649_v0, %v2149_v37  ;;  %v827_v29 = vmul.f32 0.33333334, %v1649_v0 }
 0x361   : > { %v836_v4 = vadd.f32 %v828_v23, %v2239_v57 }
 0x362   : > { %v1651_v35 = vpop.eup %1650  ;;  %1391 = vmatprep.mubr.f32.mxu1 %v843_v1  ;;  %v835_v36 = vadd.f32 %v827_v29, %v2242_v60 }
 0x363   : > { %v1653_v7 = vpop.eup %1652  ;;  %1392 = vmatmul.mubr.f32.gmra.mrb[12].mxu1 %v844_v2  ;;  %v830_v20 = vmul.f32 0.33333334, %v1651_v35  ;;  %v846_v11 = vadd.f32 %v1651_v35, %v2162_v40 }
 0x364   : > { %v845_v8 = vadd.f32 %v1653_v7, %v2157_v39  ;;  %v829_v46 = vmul.f32 0.33333334, %v1653_v7 }
 0x365   : > { %v838_v12 = vadd.f32 %v830_v20, %v2247_v3 }
 0x366   : > { %1394 = vmatprep.mubr.f32.mxu1 %v845_v8  ;;  %v837_v37 = vadd.f32 %v829_v46, %v2250_v5 }
 0x367   : > { %1395 = vmatmul.mubr.f32.gmra.mrb[14].mxu1 %v846_v11 }
 0x42e   : > { %v1387_v57 = vpop.f32.mrb[8].mxu1 }
 0x42f   : > { %v919_v60 = vadd.f32 %v1387_v57, %v1117_v38  ;;  %v913_v13 = vpop.f32.mrb[9].mxu1 }
 0x430   : > { %v914_v6 = vadd.f32 %v1117_v38, %v913_v13 }
 0x431   : > { %1654 = vtanh.f32 %v919_v60 }
 0x432   : > { %1656 = vtanh.f32 %v914_v6  ;;  %v1390_v39 = vpop.f32.mrb[10].mxu1 }
 0x433   : > { %v929_v10 = vadd.f32 %v1390_v39, %v1117_v38  ;;  %v923_v15 = vpop.f32.mrb[11].mxu1 }
 0x434   : > { %v924_v40 = vadd.f32 %v1117_v38, %v923_v15 }
 0x435   : > { %1658 = vtanh.f32 %v929_v10 }
 0x436   : > { %1660 = vtanh.f32 %v924_v40  ;;  %v1393_v3 = vpop.f32.mrb[12].mxu1 }
 0x437   : > { %v939_v17 = vadd.f32 %v1393_v3, %v1117_v38  ;;  %v933_v5 = vpop.f32.mrb[13].mxu1 }
 0x438   : > { %v934_v18 = vadd.f32 %v1117_v38, %v933_v5 }
 0x439   : > { %1662 = vtanh.f32 %v939_v17 }
 0x43a   : > { %1664 = vtanh.f32 %v934_v18  ;;  %v1396_v19 = vpop.f32.mrb[14].mxu1 }
 0x43b   : > { %v1655_v21 = vpop.eup %1654  ;;  %v949_v24 = vadd.f32 %v1396_v19, %v1117_v38  ;;  %v943_v25 = vpop.f32.mrb[15].mxu1 }
 0x43c   : > { %v1657_v27 = vpop.eup %1656  ;;  %v961_v14 = vmul.f32 0.16666667, %v1655_v21  ;;  %v944_v30 = vadd.f32 %v1117_v38, %v943_v25 }
 0x43d   : > { %v960_v31 = vmul.f32 0.16666667, %v1657_v27  ;;  %1666 = vtanh.f32 %v949_v24 }
 0x43e   : > { %v969_v32 = vadd.f32 %v961_v14, %v832_v56  ;;  %1668 = vtanh.f32 %v944_v30 }
 0x43f   : > { %v1659_v16 = vpop.eup %1658  ;;  %v968_v33 = vadd.f32 %v960_v31, %v831_v59 }
 0x440   : > { %v1661_v41 = vpop.eup %1660  ;;  %977 = vst [vmem:[%s340_s12 + $0x8] sm:$0xff] %v969_v32  ;;  %v963_v42 = vmul.f32 0.16666667, %v1659_v16 }
 0x441   : > { %976 = vst [vmem:[%s340_s12] sm:$0xff] %v968_v33  ;;  %v962_v43 = vmul.f32 0.16666667, %v1661_v41 }
 0x442   : > { %v971_v44 = vadd.f32 %v963_v42, %v834_v9 }
 0x443   : > { %v1663_v45 = vpop.eup %1662  ;;  %v970_v47 = vadd.f32 %v962_v43, %v833_v34 }
 0x444   : > { %v1665_v48 = vpop.eup %1664  ;;  %979 = vst [vmem:[%s340_s12 + $0x18] sm:$0xff] %v971_v44  ;;  %v965_v49 = vmul.f32 0.16666667, %v1663_v45 }
 0x445   : > { %978 = vst [vmem:[%s340_s12 + $0x10] sm:$0xff] %v970_v47  ;;  %v964_v22 = vmul.f32 0.16666667, %v1665_v48 }
 0x446   : > { %v973_v50 = vadd.f32 %v965_v49, %v836_v4 }
 0x447   : > { %v1667_v51 = vpop.eup %1666  ;;  %v972_v52 = vadd.f32 %v964_v22, %v835_v36 }
 0x448   : > { %v1669_v54 = vpop.eup %1668  ;;  %981 = vst [vmem:[%s340_s12 + $0x28] sm:$0xff] %v973_v50  ;;  %v967_v55 = vmul.f32 0.16666667, %v1667_v51 }
 0x449   : > { %980 = vst [vmem:[%s340_s12 + $0x20] sm:$0xff] %v972_v52  ;;  %v966_v56 = vmul.f32 0.16666667, %v1669_v54 }
 0x44a   : > { %v975_v58 = vadd.f32 %v967_v55, %v838_v12 }
 0x44b   : > { %v974_v59 = vadd.f32 %v966_v56, %v837_v37 }
 0x44c   : > { %983 = vst [vmem:[%s340_s12 + $0x38] sm:$0xff] %v975_v58 }
 0x44d   : > { %982 = vst [vmem:[%s340_s12 + $0x30] sm:$0xff] %v974_v59 }
 0x44e   : > { %1797 = shalt.err (!%p1794_p4)
}
 0x44f   : > { %s1798_s13 = scalar_lea.hbm %s2286_s23, 1024  ;;  %s1802_s14 = scalar_lea.hbm %s2338_s7, 4096 }
 0x450   : > { %p1799_p9 = scmp.ne.s32.totalorder %s2286_s23, %s1798_s13  ;;  %p1803_p8 = scmp.lt.u32.totalorder %s2286_s23, %s2338_s7 }
 0x451   : > { %p1804_p12 = scmp.lt.u32.totalorder %s1802_s14, %s1798_s13  ;;  %p1806_p0 = scmp.lt.u32.totalorder %s1798_s13, %s2286_s23 }
 0x452   : > { %p1800_p13 = pnand %p1799_p9, %p2062_p5 }
 0x453   : > { %p1805_p6 = por %p1804_p12, %p1803_p8 }
 0x454   : > { %p1801_p10 = pneg %p1800_p13 }
 0x455   : > { %p1807_p3 = por %p1806_p0, %p1805_p6 }
 0x457   : > { %p1808_p7 = pnand %p1807_p3, %p1801_p10 }
 0x459   : > { %1811 = shalt.err (!%p1808_p7)
}
 0x45a   : > { %s1867_s16 = smov 128   ;;  %s1868_s29 = smov 8  }
 0x45b   : > { %1539 = dma.vmem_to_hbm [thread:$0]  (%p2062_p5), %s2288_s21, 1024, %s2286_s23, %s985_s28, %s1867_s16, %s1867_s16, %s1868_s29  }
 0x45c PF: > { %s2358_s11 = sld [smem:[#allocation15_spill]]  ;;  %p1566_p11 = scmp.ge.s32.totalorder %s1858_s27, 2 }
 0x45d   : > { %s1013_s8 = sand.u32 1, %s1846_s24  }
 0x45e   : > { %s1014_s30 = scalar_lea.sflag [#allocation4], %s1013_s8 }
 0x462   : > { %p2359_p1 = scmp.ne.s32.totalorder %s2358_s11, 0 }
 0x464   : > { %p1556_p2 = pnand %p1566_p11, %p2359_p1 }
 0x466   : > { %1841 = dma.done.wait (!%p1556_p2), %s1014_s30, 1024  }
 0x467   : > { %1843 = vsyncadd (!%p1556_p2), %s1014_s30, 4294966272  ;;  %p22_p4 = scmp.ge.s32.totalorder %s2048_s22, 6   ;;  %s2360_s24 = smov %s1850_s25 }
 0x468   : > { %s2361_s25 = smov %s1854_s26  ;;  %s2362_s26 = smov %s2058_s18 }
 0x469   : > { %s2363_s27 = smov %s2048_s22  ;;  %24 = sbr.rel (!%p22_p4) target bundleno = 7 (0x7), region = 105 }
 0x470   :  { %1019 = vsyncpa [#allocation3], 1 }
 0x471   :  { %1021 = vsyncpa [#allocation3 + $0x1], 1 }
 0x472   :  { %1022 = vsyncpa [#allocation6], 1 }
 0x473   :  { %1023 = vsyncpa [#allocation9], 1 }
 0x474   :  { %1024 = vsyncpa [#allocation4], 1 }
 0x475   :  { %1026 = vsyncpa [#allocation4 + $0x1], 1 }

// kernel: tpu_custom_call.1
= control target key start
LH: loop header
LB: loop body
LE: loop exit
PB: predicated region body
PF: predicated region fallthrough
CT: control target
= control target key end

     0   :  { %12 = vsyncpa [#allocation3], 0  ;;  %s2331_s0 = inlined_call_operand.hbm [shape: f32[256,128], index: 0, kind: input, shape index: {}]   ;;  %s2332_s1 = inlined_call_operand.hbm [shape: f32[128,128], index: 1, kind: input, shape index: {}]   ;;  %s2333_s2 = inlined_call_operand.vmem [shape: f32[1,128], index: 2, kind: input, shape index: {}]   ;;  %s2334_s3 = inlined_call_operand.hbm [shape: f32[128,128], index: 3, kind: input, shape index: {}]   ;;  %s2335_s4 = inlined_call_operand.vmem [shape: f32[1,128], index: 4, kind: input, shape index: {}]   ;;  %s2336_s5 = inlined_call_operand.hbm [shape: f32[128,128], index: 5, kind: input, shape index: {}]   ;;  %s2337_s6 = inlined_call_operand.vmem [shape: f32[1,128], index: 6, kind: input, shape index: {}]   ;;  %s2338_s7 = inlined_call_operand.hbm [shape: f32[256,128], index: 7, kind: output, shape index: {}]  }
   0x1   :  { %14 = vsyncpa [#allocation3 + $0x1], 0 }
   0x2   :  { %15 = vsyncpa [#allocation6], 0 }
   0x3   :  { %16 = vsyncpa [#allocation9], 0 }
   0x4   :  { %17 = vsyncpa [#allocation4], 0 }
   0x5   :  { %19 = vsyncpa [#allocation4 + $0x1], 0  ;;  %s1909_s24 = smov 0   ;;  %s1911_s25 = smov 0  }
   0x6   :  { %s1913_s26 = smov 0   ;;  %s1915_s27 = smov 0  }
   0x7 LB: > { %s1930_s28 = sadd.s32 4294967295, %s1858_s27   ;;  %s1100_s29 = sadd.s32 4294967294, %s1858_s27   ;;  %s1858_s27 = sphi %s1915_s27, %s2363_s27   ;;  %s1854_s26 = sphi %s1913_s26, %s2362_s26   ;;  %s1850_s25 = sphi %s1911_s25, %s2361_s25   ;;  %s1846_s24 = sphi %s1909_s24, %s2360_s24  }
   0x8   : > { %p45_p0 = scmp.ne.s32.totalorder %s1850_s25, %s1846_s24  ;;  %p2339_p1 = scmp.eq.s32.totalorder %s1930_s28, 0 }
   0x9   : > { %p201_p3 = scmp.eq.s32.totalorder %s1100_s29, 3  ;;  %p1101_p5 = scmp.ge.s32.totalorder %s1858_s27, 1 }
   0xa   : > { %p1939_p4 = por %p2339_p1, %p45_p0  ;;  %p208_p7 = scmp.lt.s32.totalorder %s1858_s27, 5 }
   0xb   : > { %p1944_p6 = por %p201_p3, %p45_p0  ;;  %s1860_s10 = smov [#allocation5]  }
   0xc   : > { %s2343_s30 = scalar_select %p1939_p4, 1, 0 }
   0xd   : > { %s2344_s8 = scalar_select %p1944_p6, 1, 0 }
   0xe   : > { %p1949_p8 = pnand %p1101_p5, %p208_p7  ;;  %s220_s11 = sshll.u32 %s1860_s10, 4  ;;  %s1953_s11 = int_to_ptr.vmem [resolvable:$true] %s220_s11 }
   0xf   : > { %2345 = sst [smem:[#allocation15_spill]] %s2344_s8  ;;  %s1861_s13 = smov [#allocation7]  }
  0x10   : > { %s2346_s9 = scalar_select %p1949_p8, 1, 0 }
  0x11   : > { %p1541_p9 = pneg %p1949_p8  ;;  %s236_s14 = sshll.u32 %s1861_s13, 4  ;;  %s1963_s14 = int_to_ptr.vmem [resolvable:$true] %s236_s14 }
  0x12   : > { %s1862_s15 = smov [#allocation8]   ;;  %s1670_s19 = scalar_lea.hbm %s2332_s1, 2048 }
  0x13   : > { %p1959_p10 = pnand %p1541_p9, %p2339_p1  ;;  %s1965_s16 = sshll.u32 %s1862_s15, 4  ;;  %s253_s16 = int_to_ptr.vmem [resolvable:$true] %s1965_s16 }
  0x14   : > { %p1671_p11 = scmp.ne.s32.totalorder %s2332_s1, %s1670_s19  ;;  %p1677_p3 = scmp.lt.u32.totalorder %s1670_s19, %s2332_s1 }
  0x15   : > { %p1975_p12 = pneg %p1959_p10 }
  0x17   : > { %p1673_p13 = pnand %p1975_p12, %p1671_p11 }
  0x19   : > { %p1674_p0 = pneg %p1673_p13 }
  0x1b   : > { %p1679_p5 = pnand %p1677_p3, %p1674_p0 }
  0x1d   : > { %1682 = shalt.err (!%p1679_p5)
}
  0x1e   : > { %s1683_s10 = scalar_lea.vmem %s1953_s11, 2048  ;;  %p1691_p2 = scmp.lt.s32.totalorder %s1953_s11, %s1953_s11 }
  0x1f   : > { %p1684_p7 = scmp.ne.s32.totalorder %s1953_s11, %s1683_s10  ;;  %p1692_p6 = scmp.lt.s32.totalorder %s1683_s10, %s1683_s10 }
  0x21   : > { %p1686_p9 = pnand %p1684_p7, %p1975_p12  ;;  %p1693_p11 = por %p1692_p6, %p1691_p2 }
  0x23   : > { %p1687_p1 = pneg %p1686_p9 }
  0x25   : > { %p1694_p13 = pnand %p1693_p11, %p1687_p1 }
  0x27   : > { %1697 = shalt.err (!%p1694_p13)
}
  0x28   : > { %s1863_s13 = smov 128   ;;  %s1864_s15 = smov 8  }
  0x29   : > { %1544 = dma.hbm_to_vmem [thread:$0]  (!%p1959_p10), %s2332_s1, 2048, %s1953_s11, [#allocation6], %s1863_s13, %s1863_s13, %s1864_s15  }
  0x2a   : > { %s1698_s21 = scalar_lea.hbm %s2334_s3, 2048 }
  0x2b   : > { %p1699_p1 = scmp.ne.s32.totalorder %s2334_s3, %s1698_s21  ;;  %p1705_p0 = scmp.lt.u32.totalorder %s1698_s21, %s2334_s3 }
  0x2d   : > { %p1701_p2 = pnand %p1699_p1, %p1975_p12 }
  0x2f   : > { %p1702_p6 = pneg %p1701_p2 }
  0x31   : > { %p1707_p3 = pnand %p1705_p0, %p1702_p6 }
  0x33   : > { %1710 = shalt.err (!%p1707_p3)
}
  0x34   : > { %s1711_s11 = scalar_lea.vmem %s1963_s14, 2048  ;;  %p1719_p11 = scmp.lt.s32.totalorder %s1963_s14, %s1963_s14 }
  0x35   : > { %p1712_p5 = scmp.ne.s32.totalorder %s1963_s14, %s1711_s11  ;;  %p1720_p13 = scmp.lt.s32.totalorder %s1711_s11, %s1711_s11 }
  0x37   : > { %p1714_p7 = pnand %p1712_p5, %p1975_p12  ;;  %p1721_p1 = por %p1720_p13, %p1719_p11 }
  0x39   : > { %p1715_p9 = pneg %p1714_p7 }
  0x3b   : > { %p1722_p2 = pnand %p1721_p1, %p1715_p9 }
  0x3d   : > { %1725 = shalt.err (!%p1722_p2)
}
  0x3e   : > { %1547 = dma.hbm_to_vmem [thread:$0]  (!%p1959_p10), %s2334_s3, 2048, %s1963_s14, [#allocation6], %s1863_s13, %s1863_s13, %s1864_s15  }
  0x3f   : > { %s1726_s20 = scalar_lea.hbm %s2336_s5, 2048 }
  0x40   : > { %p1727_p6 = scmp.ne.s32.totalorder %s2336_s5, %s1726_s20  ;;  %p1733_p5 = scmp.lt.u32.totalorder %s1726_s20, %s2336_s5 }
  0x42   : > { %p1729_p0 = pnand %p1727_p6, %p1975_p12 }
  0x44   : > { %p1730_p3 = pneg %p1729_p0 }
  0x46   : > { %p1735_p7 = pnand %p1733_p5, %p1730_p3 }
  0x48   : > { %1738 = shalt.err (!%p1735_p7)
}
  0x49   : > { %s1739_s11 = scalar_lea.vmem %s253_s16, 2048  ;;  %p1747_p1 = scmp.lt.s32.totalorder %s253_s16, %s253_s16 }
  0x4a   : > { %p1740_p9 = scmp.ne.s32.totalorder %s253_s16, %s1739_s11  ;;  %p1748_p2 = scmp.lt.s32.totalorder %s1739_s11, %s1739_s11 }
  0x4c   : > { %p1742_p11 = pnand %p1740_p9, %p1975_p12  ;;  %p1749_p4 = por %p1748_p2, %p1747_p1 }
  0x4e   : > { %p1743_p13 = pneg %p1742_p11 }
  0x50   : > { %p1750_p8 = pnand %p1749_p4, %p1743_p13 }
  0x52   : > { %1753 = shalt.err (!%p1750_p8)
}
  0x53   : > { %1550 = dma.hbm_to_vmem [thread:$0]  (!%p1959_p10), %s2336_s5, 2048, %s253_s16, [#allocation9], %s1863_s13, %s1863_s13, %s1864_s15  }
  0x54   : > { %s2048_s22 = sadd.s32 1, %s1858_s27   ;;  %s32_s17 = sadd.s32 1, %s1854_s26 }
  0x55   : > { %s29_s12 = ssub.s32 %s1858_s27, %s2048_s22  ;;  %p39_p8 = scmp.ne.s32.totalorder %s1854_s26, %s1850_s25 }
  0x56   : > { %p30_p4 = scmp.eq.s32.totalorder %s29_s12, 0  ;;  %p40_p12 = scmp.eq.s32.totalorder %s1858_s27, 0 }
  0x57   : > { %p1562_p6 = scmp.lt.s32.totalorder %s1858_s27, 4  ;;  %p2349_p3 = scmp.eq.s32.totalorder %s1930_s28, 3 }
  0x58   : > { %s2058_s18 = scalar_select %p30_p4, %s1854_s26, %s32_s17  }
  0x59   : > { %p41_p0 = por %p40_p12, %p39_p8  ;;  %p2062_p5 = por %p2349_p3, %p39_p8 }
  0x5a   : > { %s269_s20 = sand.u32 1, %s1854_s26   ;;  %s1123_s21 = sshll.u32 %s1858_s27, 10 }
  0x5b   : > { %s1106_s16 = sshll.u32 %s269_s20, 6  ;;  %s2071_s10 = scalar_lea.hbm %s2331_s0, %s1123_s21 }
  0x5c   : > { %s273_s11 = scalar_lea.vmem [#allocation2], %s1106_s16  ;;  %p2073_p10 = pnand %p1562_p6, %p41_p0 }
  0x5d   : > { %s280_s14 = sshll.u32 %s273_s11, 4  ;;  %s2079_s12 = scalar_lea.sflag [#allocation3], %s269_s20  ;;  %s2077_s14 = int_to_ptr.vmem [resolvable:$true] %s280_s14 }
  0x5e   : > { %s1754_s17 = scalar_lea.hbm %s2071_s10, 1024  ;;  %p1756_p9 = pneg %p2073_p10 }
  0x5f   : > { %p1755_p7 = scmp.ne.s32.totalorder %s2071_s10, %s1754_s17  ;;  %s1759_s23 = scalar_lea.hbm %s2331_s0, 4096 }
  0x60   : > { %p1760_p1 = scmp.lt.u32.totalorder %s2071_s10, %s2331_s0  ;;  %p1761_p2 = scmp.lt.u32.totalorder %s1759_s23, %s1754_s17 }
  0x61   : > { %p1757_p11 = pnand %p1756_p9, %p1755_p7  ;;  %p1763_p8 = scmp.lt.u32.totalorder %s1754_s17, %s2071_s10 }
  0x62   : > { %p1762_p4 = por %p1761_p2, %p1760_p1 }
  0x63   : > { %p1758_p13 = pneg %p1757_p11 }
  0x64   : > { %p1764_p12 = por %p1763_p8, %p1762_p4 }
  0x66   : > { %p1765_p6 = pnand %p1764_p12, %p1758_p13 }
  0x68   : > { %1768 = shalt.err (!%p1765_p6)
}
  0x69   : > { %s1769_s20 = scalar_lea.vmem %s2077_s14, 1024  ;;  %s1865_s21 = smov [#allocation2]  }
  0x6a   : > { %p1770_p0 = scmp.ne.s32.totalorder %s2077_s14, %s1769_s20  ;;  %s1774_s16 = sshll.u32 %s1865_s21, 4  ;;  %s1775_s16 = int_to_ptr.vmem [resolvable:$false] %s1774_s16 }
  0x6b   : > { %s1776_s29 = scalar_lea.vmem %s1775_s16, 2048  ;;  %p1777_p11 = scmp.lt.s32.totalorder %s2077_s14, %s1775_s16 }
  0x6c   : > { %p1772_p3 = pnand %p1770_p0, %p1756_p9  ;;  %p1778_p1 = scmp.lt.s32.totalorder %s1776_s29, %s1769_s20 }
  0x6e   : > { %p1773_p7 = pneg %p1772_p3  ;;  %p1779_p2 = por %p1778_p1, %p1777_p11 }
  0x70   : > { %p1780_p4 = pnand %p1779_p2, %p1773_p7 }
  0x72   : > { %1783 = shalt.err (!%p1780_p4)
}
  0x73   : > { %1554 = dma.hbm_to_vmem [thread:$0]  (!%p2073_p10), %s2071_s10, 1024, %s2077_s14, %s2079_s12, %s1863_s13, %s1863_s13, %s1864_s15  }
  0x74   : > { %p2352_p9 = scmp.ne.s32.totalorder %s2346_s9, 0 }
  0x75   : > { %s2113_s17 = sand.u32 (!%p2352_p9), 1, %s1850_s25   ;;  %p2353_p13 = scmp.ne.s32.totalorder (!%p2352_p9), %s2343_s30, 0 }
  0x76   : > { %292 = sbr.rel (%p2352_p9) target bundleno = 1116 (0x45c), region = 48  ;;  %s1110_s23 = sshll.u32 (!%p2352_p9), %s2113_s17, 6 }
  0x77   : > { %s295_s11 = scalar_lea.sflag (!%p2352_p9), [#allocation3], %s2113_s17  ;;  %s2119_s8 = scalar_lea.vmem (!%p2352_p9), [#allocation2], %s1110_s23 }
  0x7d   : > { %1829 = dma.done.wait (%p2353_p13), %s295_s11, 1024  }
  0x7e   : > { %1831 = vsyncadd (%p2353_p13), %s295_s11, 4294966272  ;;  %p2354_p10 = scmp.eq.s32.totalorder %s1930_s28, 0 }
  0x80   : > { %1833 = dma.done.wait (%p2354_p10), [#allocation6], 4096   ;;  %p2355_p8 = pmov %p2354_p10 }
  0x82   : > { %1835 = vsyncadd (%p2355_p8), [#allocation6], 4294963200  ;;  %p2356_p12 = pmov %p2355_p8 }
  0x83   : > { %p2357_p6 = pmov %p2355_p8 }
  0x84   : > { %1837 = dma.done.wait (%p2356_p12), [#allocation9], 2048  }
  0x85   : > { %1839 = vsyncadd (%p2357_p6), [#allocation9], 4294965248  ;;  %v351_v0 = vld [vmem:[#allocation5] sm:$0xff]  ;;  %v352_v1 = vld [vmem:[#allocation5 + $0x8] sm:$0xff]  ;;  %s340_s12 = scalar_lea.vmem [#allocation10], %s1110_s23  ;;  %s1124_s20 = sshll.u32 %s1930_s28, 10 }
  0x86   : > { %v353_v2 = vld [vmem:[#allocation5 + $0x10] sm:$0xff]  ;;  %v1397_v3 = vpack.c.bf16 %v352_v1, %v351_v0  ;;  %v354_v4 = vld [vmem:[#allocation5 + $0x18] sm:$0xff]  ;;  %v355_v6 = vld [vmem:[#allocation5 + $0x20] sm:$0xff]  ;;  %s998_s21 = sshll.u32 %s340_s12, 4  ;;  %s2286_s23 = scalar_lea.hbm %s2338_s7, %s1124_s20  ;;  %s2288_s21 = int_to_ptr.vmem [resolvable:$true] %s998_s21 }
  0x87   : > { %v1401_v5 = vpack.c.bf16 %v354_v4, %v353_v2  ;;  %v356_v7 = vld [vmem:[#allocation5 + $0x28] sm:$0xff]  ;;  %v2134_v9 = vld [vmem:[%s2119_s8] sm:$0xff]  ;;  %v357_v10 = vld [vmem:[#allocation5 + $0x30] sm:$0xff]  ;;  %s985_s28 = scalar_lea.sflag [#allocation4], %s2113_s17  ;;  %s1784_s11 = scalar_lea.vmem %s2288_s21, 1024 }
  0x88   : > { %1398 = vmatprep.subr.bf16.mxu0 %v1397_v3  ;;  %v1405_v8 = vpack.c.bf16 %v356_v7, %v355_v6  ;;  %v358_v11 = vld [vmem:[#allocation5 + $0x38] sm:$0xff]  ;;  %1253 = vmatprep.mubr.f32.mxu0 %v2134_v9  ;;  %v367_v12 = vld [vmem:[#allocation7] sm:$0xff]  ;;  %v368_v13 = vld [vmem:[#allocation7 + $0x8] sm:$0xff]  ;;  %p1785_p0 = scmp.ne.s32.totalorder %s2288_s21, %s1784_s11 }
  0x89   : > { %1400 = vmatpush3.bf16.msra.mxu0 %v1397_v3  ;;  %v369_v14 = vld [vmem:[#allocation7 + $0x10] sm:$0xff]  ;;  %v1409_v15 = vpack.c.bf16 %v358_v11, %v357_v10  ;;  %v359_v16 = vld [vmem:[#allocation5 + $0x40] sm:$0xff]  ;;  %v1429_v17 = vpack.c.bf16 %v368_v13, %v367_v12  ;;  %v370_v18 = vld [vmem:[#allocation7 + $0x18] sm:$0xff] }
  0x8a   : > { %1402 = vmatprep.subr.bf16.mxu0 %v1401_v5  ;;  %v360_v19 = vld [vmem:[#allocation5 + $0x48] sm:$0xff]  ;;  %v1433_v20 = vpack.c.bf16 %v370_v18, %v369_v14  ;;  %v371_v21 = vld [vmem:[#allocation7 + $0x20] sm:$0xff]  ;;  %v361_v25 = vld [vmem:[#allocation5 + $0x50] sm:$0xff]  ;;  %p1786_p3 = pnand %p1785_p0, %p2062_p5 }
  0x8b   : > { %v372_v22 = vld [vmem:[#allocation7 + $0x28] sm:$0xff]  ;;  %1430 = vmatprep.subr.bf16.mxu1 %v1429_v17  ;;  %v1413_v23 = vpack.c.bf16 %v360_v19, %v359_v16  ;;  %v362_v26 = vld [vmem:[#allocation5 + $0x58] sm:$0xff]  ;;  %v363_v28 = vld [vmem:[#allocation5 + $0x60] sm:$0xff] }
  0x8c   : > { %1432 = vmatpush3.bf16.msra.mxu1 %v1429_v17  ;;  %v1437_v24 = vpack.c.bf16 %v372_v22, %v371_v21  ;;  %v1417_v27 = vpack.c.bf16 %v362_v26, %v361_v25  ;;  %v364_v29 = vld [vmem:[#allocation5 + $0x68] sm:$0xff]  ;;  %v365_v31 = vld [vmem:[#allocation5 + $0x70] sm:$0xff]  ;;  %v366_v32 = vld [vmem:[#allocation5 + $0x78] sm:$0xff]  ;;  %p1787_p7 = pneg %p1786_p3 }
  0x8d   : > { %1404 = vmatpush3.bf16.msra.mxu0 %v1401_v5  ;;  %1434 = vmatprep.subr.bf16.mxu1 %v1433_v20  ;;  %v1421_v30 = vpack.c.bf16 %v364_v29, %v363_v28  ;;  %v1425_v33 = vpack.c.bf16 %v366_v32, %v365_v31  ;;  %v2138_v34 = vld [vmem:[%s2119_s8 + $0x8] sm:$0xff]  ;;  %v2141_v35 = vld [vmem:[%s2119_s8 + $0x10] sm:$0xff]  ;;  %v2146_v36 = vld [vmem:[%s2119_s8 + $0x18] sm:$0xff] }
  0x8e   : > { %1406 = vmatprep.subr.bf16.mxu0 %v1405_v8  ;;  %v2149_v37 = vld [vmem:[%s2119_s8 + $0x20] sm:$0xff]  ;;  %v2154_v38 = vld [vmem:[%s2119_s8 + $0x28] sm:$0xff]  ;;  %v2157_v39 = vld [vmem:[%s2119_s8 + $0x30] sm:$0xff] }
  0x8f   : > { %v2162_v40 = vld [vmem:[%s2119_s8 + $0x38] sm:$0xff]  ;;  %v373_v41 = vld [vmem:[#allocation7 + $0x30] sm:$0xff]  ;;  %v375_v44 = vld [vmem:[#allocation7 + $0x40] sm:$0xff]  ;;  %s1866_s8 = smov [#allocation10]  }
  0x90   : > { %1436 = vmatpush3.bf16.msra.mxu1 %v1433_v20  ;;  %v374_v42 = vld [vmem:[#allocation7 + $0x38] sm:$0xff]  ;;  %v376_v45 = vld [vmem:[#allocation7 + $0x48] sm:$0xff]  ;;  %v377_v47 = vld [vmem:[#allocation7 + $0x50] sm:$0xff]  ;;  %s1788_s30 = sshll.u32 %s1866_s8, 4  ;;  %s1789_s30 = int_to_ptr.vmem [resolvable:$false] %s1788_s30 }
  0x91   : > { %1408 = vmatpush3.bf16.msra.mxu0 %v1405_v8  ;;  %1438 = vmatprep.subr.bf16.mxu1 %v1437_v24  ;;  %v1441_v43 = vpack.c.bf16 %v374_v42, %v373_v41  ;;  %v1445_v46 = vpack.c.bf16 %v376_v45, %v375_v44  ;;  %v378_v48 = vld [vmem:[#allocation7 + $0x58] sm:$0xff]  ;;  %v379_v50 = vld [vmem:[#allocation7 + $0x60] sm:$0xff]  ;;  %v380_v51 = vld [vmem:[#allocation7 + $0x68] sm:$0xff]  ;;  %s1790_s9 = scalar_lea.vmem %s1789_s30, 2048  ;;  %p1791_p11 = scmp.lt.s32.totalorder %s2288_s21, %s1789_s30 }
  0x92   : > { %1410 = vmatprep.subr.bf16.mxu0 %v1409_v15  ;;  %v1449_v49 = vpack.c.bf16 %v378_v48, %v377_v47  ;;  %v1453_v52 = vpack.c.bf16 %v380_v51, %v379_v50  ;;  %v381_v53 = vld [vmem:[#allocation7 + $0x70] sm:$0xff]  ;;  %v382_v54 = vld [vmem:[#allocation7 + $0x78] sm:$0xff]  ;;  %v1115_v56 = vld [vmem:[%s2333_s2] ss:$0 sm:$0xff]  ;;  %p1792_p1 = scmp.lt.s32.totalorder %s1790_s9, %s1784_s11 }
  0x93   : > { %v1457_v55 = vpack.c.bf16 %v382_v54, %v381_v53  ;;  %v383_v41 = vld [vmem:[#allocation8] sm:$0xff]  ;;  %v384_v42 = vld [vmem:[#allocation8 + $0x8] sm:$0xff]  ;;  %v386_v45 = vld [vmem:[#allocation8 + $0x18] sm:$0xff] }
  0x94   : > { %1440 = vmatpush3.bf16.msra.mxu1 %v1437_v24  ;;  %v1493_v44 = vpack.c.bf16 %v384_v42, %v383_v41  ;;  %v387_v47 = vld [vmem:[#allocation8 + $0x20] sm:$0xff]  ;;  %v388_v48 = vld [vmem:[#allocation8 + $0x28] sm:$0xff]  ;;  %v389_v50 = vld [vmem:[#allocation8 + $0x30] sm:$0xff]  ;;  %p1793_p2 = por %p1792_p1, %p1791_p11 }
  0x95   : > { %1412 = vmatpush3.bf16.msra.mxu0 %v1409_v15  ;;  %1442 = vmatprep.subr.bf16.mxu1 %v1441_v43  ;;  %v390_v51 = vld [vmem:[#allocation8 + $0x38] sm:$0xff]  ;;  %v2203_v53 = vld [vmem:[%s2335_s4] ss:$0 sm:$0xff] }
  0x96   : > { %1414 = vmatprep.subr.bf16.mxu0 %v1413_v23  ;;  %p1794_p4 = pnand %p1793_p2, %p1787_p7 }
  0x98   : > { %1444 = vmatpush3.bf16.msra.mxu1 %v1441_v43 }
  0x99   : > { %1416 = vmatpush3.bf16.msra.mxu0 %v1413_v23  ;;  %1446 = vmatprep.subr.bf16.mxu1 %v1445_v46 }
  0x9a   : > { %1418 = vmatprep.subr.bf16.mxu0 %v1417_v27 }
  0x9c   : > { %1448 = vmatpush3.bf16.msra.mxu1 %v1445_v46 }
  0x9d   : > { %1420 = vmatpush3.bf16.msra.mxu0 %v1417_v27  ;;  %1450 = vmatprep.subr.bf16.mxu1 %v1449_v49 }
  0x9e   : > { %1422 = vmatprep.subr.bf16.mxu0 %v1421_v30 }
  0xa0   : > { %1452 = vmatpush3.bf16.msra.mxu1 %v1449_v49 }
  0xa1   : > { %1424 = vmatpush3.bf16.msra.mxu0 %v1421_v30  ;;  %1454 = vmatprep.subr.bf16.mxu1 %v1453_v52 }
  0xa2   : > { %1426 = vmatprep.subr.bf16.mxu0 %v1425_v33 }
  0xa4   : > { %1456 = vmatpush3.bf16.msra.mxu1 %v1453_v52 }
  0xa5   : > { %1428 = vmatpush3.bf16.msra.mxu0 %v1425_v33  ;;  %1458 = vmatprep.subr.bf16.mxu1 %v1457_v55 }
  0xa6   : > { %1462 = vmatprep.subr.bf16.mxu0 %v1429_v17 }
  0xa8   : > { %1254 = vmatmul.mubr.f32.vlgmr.msra.gmra.mrb[0].mxu0 %v2138_v34  ;;  %1460 = vmatpush3.bf16.msra.mxu1 %v1457_v55 }
  0xa9   : > { %1256 = vmatprep.mubr.f32.mxu0 %v2141_v35  ;;  %1464 = vmatpush3.bf16.msra.mxu0 %v1429_v17 }
  0xaa   : > { %1466 = vmatprep.subr.bf16.mxu0 %v1433_v20  ;;  %1494 = vmatprep.subr.bf16.mxu1 %v1493_v44 }
  0xac   : > { %1257 = vmatmul.mubr.f32.gmra.mrb[2].mxu0 %v2146_v36 }
  0xad   : > { %1259 = vmatprep.mubr.f32.mxu0 %v2149_v37  ;;  %1468 = vmatpush3.bf16.msra.mxu0 %v1433_v20 }
  0xae   : > { %1470 = vmatprep.subr.bf16.mxu0 %v1437_v24 }
  0xb0   : > { %1260 = vmatmul.mubr.f32.gmra.mrb[4].mxu0 %v2154_v38 }
  0xb1   : > { %1262 = vmatprep.mubr.f32.mxu0 %v2157_v39  ;;  %1472 = vmatpush3.bf16.msra.mxu0 %v1437_v24 }
  0xb2   : > { %1474 = vmatprep.subr.bf16.mxu0 %v1441_v43 }
  0xb4   : > { %1263 = vmatmul.mubr.f32.gmra.mrb[6].mxu0 %v2162_v40 }
  0xb5   : > { %1476 = vmatpush3.bf16.msra.mxu0 %v1441_v43  ;;  %v385_v43 = vld [vmem:[#allocation8 + $0x10] sm:$0xff] }
  0xb6   : > { %1478 = vmatprep.subr.bf16.mxu0 %v1445_v46 }
  0xb9   : > { %1480 = vmatpush3.bf16.msra.mxu0 %v1445_v46  ;;  %v1497_v46 = vpack.c.bf16 %v386_v45, %v385_v43 }
  0xba   : > { %1482 = vmatprep.subr.bf16.mxu0 %v1449_v49 }
  0xbd   : > { %1484 = vmatpush3.bf16.msra.mxu0 %v1449_v49  ;;  %v1501_v49 = vpack.c.bf16 %v388_v48, %v387_v47 }
  0xbe   : > { %1486 = vmatprep.subr.bf16.mxu0 %v1453_v52 }
  0xc1   : > { %1488 = vmatpush3.bf16.msra.mxu0 %v1453_v52  ;;  %v1505_v52 = vpack.c.bf16 %v390_v51, %v389_v50 }
  0xc2   : > { %1490 = vmatprep.subr.bf16.mxu0 %v1457_v55 }
  0xc5   : > { %1492 = vmatpush3.bf16.msra.mxu0 %v1457_v55 }
 0x17b   : > { %v1255_v57 = vpop.f32.mrb[0].mxu0 }
 0x17c   : > { %v492_v58 = vadd.f32 %v1255_v57, %v1115_v56  ;;  %v486_v59 = vpop.f32.mrb[1].mxu0 }
 0x17d   : > { %v487_v60 = vadd.f32 %v1115_v56, %v486_v59 }
 0x17e   : > { %1606 = vtanh.f32 %v492_v58 }
 0x17f   : > { %1608 = vtanh.f32 %v487_v60  ;;  %v1258_v61 = vpop.f32.mrb[2].mxu0 }
 0x180   : > { %v502_v62 = vadd.f32 %v1258_v61, %v1115_v56  ;;  %v496_v63 = vpop.f32.mrb[3].mxu0 }
 0x181   : > { %v497_v0 = vadd.f32 %v1115_v56, %v496_v63 }
 0x182   : > { %1610 = vtanh.f32 %v502_v62 }
 0x183   : > { %1612 = vtanh.f32 %v497_v0  ;;  %v1261_v1 = vpop.f32.mrb[4].mxu0 }
 0x184   : > { %v512_v2 = vadd.f32 %v1261_v1, %v1115_v56  ;;  %v506_v3 = vpop.f32.mrb[5].mxu0 }
 0x185   : > { %v507_v4 = vadd.f32 %v1115_v56, %v506_v3 }
 0x186   : > { %1614 = vtanh.f32 %v512_v2 }
 0x187   : > { %1616 = vtanh.f32 %v507_v4  ;;  %v1264_v5 = vpop.f32.mrb[6].mxu0 }
 0x188   : > { %v2168_v6 = vpop.eup %1606  ;;  %v522_v7 = vadd.f32 %v1264_v5, %v1115_v56  ;;  %v516_v8 = vpop.f32.mrb[7].mxu0 }
 0x189   : > { %v2170_v10 = vpop.eup %1608  ;;  %v517_v11 = vadd.f32 %v1115_v56, %v516_v8  ;;  %v550_v12 = vmul.f32 0.5, %v2168_v6  ;;  %v534_v63 = vmul.f32 0.16666667, %v2168_v6 }
 0x18a   : > { %1618 = vtanh.f32 %v522_v7  ;;  %v549_v13 = vmul.f32 0.5, %v2170_v10  ;;  %v533_v0 = vmul.f32 0.16666667, %v2170_v10 }
 0x18b   : > { %1620 = vtanh.f32 %v517_v11  ;;  %v558_v17 = vadd.f32 %v550_v12, %v2138_v34  ;;  %v542_v11 = vadd.f32 %v534_v63, %v2138_v34 }
 0x18c   : > { %v2174_v14 = vpop.eup %1610  ;;  %v557_v15 = vadd.f32 %v549_v13, %v2134_v9  ;;  %v541_v12 = vadd.f32 %v533_v0, %v2134_v9 }
 0x18d   : > { %v2177_v16 = vpop.eup %1612  ;;  %v552_v18 = vmul.f32 0.5, %v2174_v14  ;;  %v536_v6 = vmul.f32 0.16666667, %v2174_v14 }
 0x18e   : > { %1297 = vmatprep.mubr.f32.mxu1 %v557_v15  ;;  %v551_v19 = vmul.f32 0.5, %v2177_v16 }
 0x18f   : > { %1298 = vmatmul.mubr.f32.vlgmr.msra.gmra.mrb[0].mxu1 %v558_v17  ;;  %v560_v23 = vadd.f32 %v552_v18, %v2146_v36  ;;  %v535_v18 = vmul.f32 0.16666667, %v2177_v16 }
 0x190   : > { %v2182_v20 = vpop.eup %1614  ;;  %v559_v21 = vadd.f32 %v551_v19, %v2141_v35  ;;  %1496 = vmatpush3.bf16.msra.mxu1 %v1493_v44 }
 0x191   : > { %v2185_v22 = vpop.eup %1616  ;;  %v554_v24 = vmul.f32 0.5, %v2182_v20  ;;  %1498 = vmatprep.subr.bf16.mxu1 %v1497_v46  ;;  %v543_v42 = vadd.f32 %v535_v18, %v2141_v35 }
 0x192   : > { %1300 = vmatprep.mubr.f32.mxu1 %v559_v21  ;;  %v553_v25 = vmul.f32 0.5, %v2185_v22 }
 0x193   : > { %1301 = vmatmul.mubr.f32.gmra.mrb[2].mxu1 %v560_v23  ;;  %v562_v29 = vadd.f32 %v554_v24, %v2154_v38 }
 0x194   : > { %v2190_v26 = vpop.eup %1618  ;;  %v561_v27 = vadd.f32 %v553_v25, %v2149_v37  ;;  %1500 = vmatpush3.bf16.msra.mxu1 %v1497_v46  ;;  %v538_v25 = vmul.f32 0.16666667, %v2182_v20 }
 0x195   : > { %v2193_v28 = vpop.eup %1620  ;;  %v556_v30 = vmul.f32 0.5, %v2190_v26  ;;  %1502 = vmatprep.subr.bf16.mxu1 %v1501_v49 }
 0x196   : > { %1303 = vmatprep.mubr.f32.mxu1 %v561_v27  ;;  %v555_v31 = vmul.f32 0.5, %v2193_v28  ;;  %v546_v47 = vadd.f32 %v538_v25, %v2154_v38 }
 0x197   : > { %1304 = vmatmul.mubr.f32.gmra.mrb[4].mxu1 %v562_v29  ;;  %v564_v33 = vadd.f32 %v556_v30, %v2162_v40 }
 0x198   : > { %v563_v32 = vadd.f32 %v555_v31, %v2157_v39  ;;  %1504 = vmatpush3.bf16.msra.mxu1 %v1501_v49  ;;  %v540_v49 = vmul.f32 0.16666667, %v2190_v26 }
 0x199   : > { %1506 = vmatprep.subr.bf16.mxu1 %v1505_v52 }
 0x19a   : > { %1306 = vmatprep.mubr.f32.mxu1 %v563_v32  ;;  %v544_v32 = vadd.f32 %v536_v6, %v2146_v36  ;;  %v548_v63 = vadd.f32 %v540_v49, %v2162_v40  ;;  %v394_v6 = vld [vmem:[#allocation8 + $0x58] sm:$0xff] }
 0x19b   : > { %1307 = vmatmul.mubr.f32.gmra.mrb[6].mxu1 %v564_v33  ;;  %v537_v33 = vmul.f32 0.16666667, %v2185_v22 }
 0x19c   : > { %1508 = vmatpush3.bf16.msra.mxu1 %v1505_v52  ;;  %v539_v52 = vmul.f32 0.16666667, %v2193_v28 }
 0x262   : > { %v1299_v54 = vpop.f32.mrb[0].mxu1 }
 0x263   : > { %v637_v55 = vadd.f32 %v1299_v54, %v2203_v53  ;;  %v631_v56 = vpop.f32.mrb[1].mxu1 }
 0x264   : > { %v632_v57 = vadd.f32 %v2203_v53, %v631_v56 }
 0x265   : > { %1622 = vtanh.f32 %v637_v55  ;;  %v545_v55 = vadd.f32 %v537_v33, %v2149_v37 }
 0x266   : > { %1624 = vtanh.f32 %v632_v57  ;;  %v1302_v58 = vpop.f32.mrb[2].mxu1 }
 0x267   : > { %v647_v59 = vadd.f32 %v1302_v58, %v2203_v53  ;;  %v641_v60 = vpop.f32.mrb[3].mxu1 }
 0x268   : > { %v642_v61 = vadd.f32 %v2203_v53, %v641_v60 }
 0x269   : > { %1626 = vtanh.f32 %v647_v59 }
 0x26a   : > { %1628 = vtanh.f32 %v642_v61  ;;  %v1305_v62 = vpop.f32.mrb[4].mxu1 }
 0x26b   : > { %v657_v1 = vadd.f32 %v1305_v62, %v2203_v53  ;;  %v651_v2 = vpop.f32.mrb[5].mxu1 }
 0x26c   : > { %v652_v3 = vadd.f32 %v2203_v53, %v651_v2 }
 0x26d   : > { %1630 = vtanh.f32 %v657_v1  ;;  %v547_v1 = vadd.f32 %v539_v52, %v2157_v39 }
 0x26e   : > { %1632 = vtanh.f32 %v652_v3  ;;  %v1308_v4 = vpop.f32.mrb[6].mxu1 }
 0x26f   : > { %v1623_v5 = vpop.eup %1622  ;;  %v667_v7 = vadd.f32 %v1308_v4, %v2203_v53  ;;  %v661_v8 = vpop.f32.mrb[7].mxu1 }
 0x270   : > { %v1625_v13 = vpop.eup %1624  ;;  %v695_v10 = vmul.f32 0.5, %v1623_v5  ;;  %v662_v15 = vadd.f32 %v2203_v53, %v661_v8  ;;  %v679_v17 = vmul.f32 0.33333334, %v1623_v5  ;;  %v391_v8 = vld [vmem:[#allocation8 + $0x40] sm:$0xff] }
 0x271   : > { %1634 = vtanh.f32 %v667_v7  ;;  %v694_v19 = vmul.f32 0.5, %v1625_v13  ;;  %v678_v21 = vmul.f32 0.33333334, %v1625_v13  ;;  %v393_v13 = vld [vmem:[#allocation8 + $0x50] sm:$0xff] }
 0x272   : > { %1636 = vtanh.f32 %v662_v15  ;;  %v2219_v23 = vadd.f32 %v679_v17, %v542_v11  ;;  %v703_v30 = vadd.f32 %v695_v10, %v2138_v34  ;;  %v392_v11 = vld [vmem:[#allocation8 + $0x48] sm:$0xff]  ;;  %v1513_v10 = vpack.c.bf16 %v394_v6, %v393_v13  ;;  %v395_v15 = vld [vmem:[#allocation8 + $0x60] sm:$0xff] }
 0x273   : > { %v1627_v24 = vpop.eup %1626  ;;  %v702_v27 = vadd.f32 %v694_v19, %v2134_v9  ;;  %v2223_v29 = vadd.f32 %v678_v21, %v541_v12  ;;  %v1509_v12 = vpack.c.bf16 %v392_v11, %v391_v8  ;;  %v396_v17 = vld [vmem:[#allocation8 + $0x68] sm:$0xff]  ;;  %v397_v19 = vld [vmem:[#allocation8 + $0x70] sm:$0xff]  ;;  %v398_v21 = vld [vmem:[#allocation8 + $0x78] sm:$0xff] }
 0x274   : > { %v1629_v14 = vpop.eup %1628  ;;  %v697_v31 = vmul.f32 0.5, %v1627_v24  ;;  %v681_v16 = vmul.f32 0.33333334, %v1627_v24  ;;  %v1517_v18 = vpack.c.bf16 %v396_v17, %v395_v15  ;;  %v1521_v24 = vpack.c.bf16 %v398_v21, %v397_v19 }
 0x275   : > { %1341 = vmatprep.mubr.f32.mxu0 %v702_v27  ;;  %v696_v41 = vmul.f32 0.5, %v1629_v14  ;;  %v680_v43 = vmul.f32 0.33333334, %v1629_v14  ;;  %1510 = vmatprep.subr.bf16.mxu1 %v1509_v12 }
 0x276   : > { %1342 = vmatmul.mubr.f32.vlgmr.msra.gmra.mrb[8].mxu0 %v703_v30  ;;  %v2229_v20 = vadd.f32 %v681_v16, %v544_v32  ;;  %v705_v22 = vadd.f32 %v697_v31, %v2146_v36  ;;  %1512 = vmatpush3.bf16.msra.mxu1 %v1509_v12 }
 0x277   : > { %v1631_v44 = vpop.eup %1630  ;;  %v704_v45 = vadd.f32 %v696_v41, %v2141_v35  ;;  %v2232_v46 = vadd.f32 %v680_v43, %v543_v42  ;;  %1514 = vmatprep.subr.bf16.mxu1 %v1513_v10 }
 0x278   : > { %v1633_v48 = vpop.eup %1632  ;;  %v699_v50 = vmul.f32 0.5, %v1631_v44  ;;  %v683_v51 = vmul.f32 0.33333334, %v1631_v44 }
 0x279   : > { %1344 = vmatprep.mubr.f32.mxu0 %v704_v45  ;;  %v698_v54 = vmul.f32 0.5, %v1633_v48  ;;  %v682_v56 = vmul.f32 0.33333334, %v1633_v48 }
 0x27a   : > { %1345 = vmatmul.mubr.f32.gmra.mrb[10].mxu0 %v705_v22  ;;  %v2239_v57 = vadd.f32 %v683_v51, %v546_v47  ;;  %v707_v61 = vadd.f32 %v699_v50, %v2154_v38  ;;  %1516 = vmatpush3.bf16.msra.mxu1 %v1513_v10 }
 0x27b   : > { %v1635_v58 = vpop.eup %1634  ;;  %v706_v59 = vadd.f32 %v698_v54, %v2149_v37  ;;  %v2242_v60 = vadd.f32 %v682_v56, %v545_v55  ;;  %1518 = vmatprep.subr.bf16.mxu1 %v1517_v18 }
 0x27c   : > { %v1637_v26 = vpop.eup %1636  ;;  %v701_v62 = vmul.f32 0.5, %v1635_v58  ;;  %v685_v28 = vmul.f32 0.33333334, %v1635_v58 }
 0x27d   : > { %1347 = vmatprep.mubr.f32.mxu0 %v706_v59  ;;  %v700_v0 = vmul.f32 0.5, %v1637_v26  ;;  %v684_v2 = vmul.f32 0.33333334, %v1637_v26 }
 0x27e   : > { %1348 = vmatmul.mubr.f32.gmra.mrb[12].mxu0 %v707_v61  ;;  %v2247_v3 = vadd.f32 %v685_v28, %v548_v63  ;;  %v709_v7 = vadd.f32 %v701_v62, %v2162_v40  ;;  %1520 = vmatpush3.bf16.msra.mxu1 %v1517_v18 }
 0x27f   : > { %v708_v4 = vadd.f32 %v700_v0, %v2157_v39  ;;  %v2250_v5 = vadd.f32 %v684_v2, %v547_v1  ;;  %1522 = vmatprep.subr.bf16.mxu1 %v1521_v24 }
 0x281   : > { %1350 = vmatprep.mubr.f32.mxu0 %v708_v4 }
 0x282   : > { %1351 = vmatmul.mubr.f32.gmra.mrb[14].mxu0 %v709_v7  ;;  %1524 = vmatpush3.bf16.msra.mxu1 %v1521_v24 }
 0x349   : > { %v1343_v25 = vpop.f32.mrb[8].mxu0 }
 0x34a   : > { %v782_v27 = vadd.f32 %v1343_v25, %v2203_v53  ;;  %v776_v14 = vpop.f32.mrb[9].mxu0 }
 0x34b   : > { %v777_v30 = vadd.f32 %v2203_v53, %v776_v14 }
 0x34c   : > { %1638 = vtanh.f32 %v782_v27 }
 0x34d   : > { %1640 = vtanh.f32 %v777_v30  ;;  %v1346_v31 = vpop.f32.mrb[10].mxu0 }
 0x34e   : > { %v792_v32 = vadd.f32 %v1346_v31, %v2203_v53  ;;  %v786_v16 = vpop.f32.mrb[11].mxu0 }
 0x34f   : > { %v787_v33 = vadd.f32 %v2203_v53, %v786_v16 }
 0x350   : > { %1642 = vtanh.f32 %v792_v32 }
 0x351   : > { %1644 = vtanh.f32 %v787_v33  ;;  %v1349_v41 = vpop.f32.mrb[12].mxu0 }
 0x352   : > { %v802_v42 = vadd.f32 %v1349_v41, %v2203_v53  ;;  %v796_v43 = vpop.f32.mrb[13].mxu0 }
 0x353   : > { %v797_v44 = vadd.f32 %v2203_v53, %v796_v43 }
 0x354   : > { %1646 = vtanh.f32 %v802_v42 }
 0x355   : > { %1648 = vtanh.f32 %v797_v44  ;;  %v1352_v45 = vpop.f32.mrb[14].mxu0 }
 0x356   : > { %v1639_v47 = vpop.eup %1638  ;;  %v812_v48 = vadd.f32 %v1352_v45, %v2203_v53  ;;  %v806_v49 = vpop.f32.mrb[15].mxu0 }
 0x357   : > { %v1641_v22 = vpop.eup %1640  ;;  %v807_v50 = vadd.f32 %v2203_v53, %v806_v49  ;;  %v824_v51 = vmul.f32 0.33333334, %v1639_v47  ;;  %v840_v55 = vadd.f32 %v1639_v47, %v2138_v34 }
 0x358   : > { %1650 = vtanh.f32 %v812_v48  ;;  %v839_v52 = vadd.f32 %v1641_v22, %v2134_v9  ;;  %v823_v54 = vmul.f32 0.33333334, %v1641_v22 }
 0x359   : > { %1652 = vtanh.f32 %v807_v50  ;;  %v832_v56 = vadd.f32 %v824_v51, %v2219_v23 }
 0x35a   : > { %v1643_v58 = vpop.eup %1642  ;;  %1385 = vmatprep.mubr.f32.mxu1 %v839_v52  ;;  %v831_v59 = vadd.f32 %v823_v54, %v2223_v29 }
 0x35b   : > { %v1645_v26 = vpop.eup %1644  ;;  %1386 = vmatmul.mubr.f32.vlgmr.msra.gmra.mrb[8].mxu1 %v840_v55  ;;  %v826_v61 = vmul.f32 0.33333334, %v1643_v58  ;;  %v842_v63 = vadd.f32 %v1643_v58, %v2146_v36 }
 0x35c   : > { %v841_v62 = vadd.f32 %v1645_v26, %v2141_v35  ;;  %v825_v53 = vmul.f32 0.33333334, %v1645_v26 }
 0x35d   : > { %v834_v9 = vadd.f32 %v826_v61, %v2229_v20 }
 0x35e   : > { %v1647_v28 = vpop.eup %1646  ;;  %1388 = vmatprep.mubr.f32.mxu1 %v841_v62  ;;  %v833_v34 = vadd.f32 %v825_v53, %v2232_v46 }
 0x35f   : > { %v1649_v0 = vpop.eup %1648  ;;  %1389 = vmatmul.mubr.f32.gmra.mrb[10].mxu1 %v842_v63  ;;  %v828_v23 = vmul.f32 0.33333334, %v1647_v28  ;;  %v844_v2 = vadd.f32 %v1647_v28, %v2154_v38  ;;  %v1117_v38 = vld [vmem:[%s2337_s6] ss:$0 sm:$0xff] }
 0x360   : > { %v843_v1 = vadd.f32 %v1649_v0, %v2149_v37  ;;  %v827_v29 = vmul.f32 0.33333334, %v1649_v0 }
 0x361   : > { %v836_v4 = vadd.f32 %v828_v23, %v2239_v57 }
 0x362   : > { %v1651_v35 = vpop.eup %1650  ;;  %1391 = vmatprep.mubr.f32.mxu1 %v843_v1  ;;  %v835_v36 = vadd.f32 %v827_v29, %v2242_v60 }
 0x363   : > { %v1653_v7 = vpop.eup %1652  ;;  %1392 = vmatmul.mubr.f32.gmra.mrb[12].mxu1 %v844_v2  ;;  %v830_v20 = vmul.f32 0.33333334, %v1651_v35  ;;  %v846_v11 = vadd.f32 %v1651_v35, %v2162_v40 }
 0x364   : > { %v845_v8 = vadd.f32 %v1653_v7, %v2157_v39  ;;  %v829_v46 = vmul.f32 0.33333334, %v1653_v7 }
 0x365   : > { %v838_v12 = vadd.f32 %v830_v20, %v2247_v3 }
 0x366   : > { %1394 = vmatprep.mubr.f32.mxu1 %v845_v8  ;;  %v837_v37 = vadd.f32 %v829_v46, %v2250_v5 }
 0x367   : > { %1395 = vmatmul.mubr.f32.gmra.mrb[14].mxu1 %v846_v11 }
 0x42e   : > { %v1387_v57 = vpop.f32.mrb[8].mxu1 }
 0x42f   : > { %v919_v60 = vadd.f32 %v1387_v57, %v1117_v38  ;;  %v913_v13 = vpop.f32.mrb[9].mxu1 }
 0x430   : > { %v914_v6 = vadd.f32 %v1117_v38, %v913_v13 }
 0x431   : > { %1654 = vtanh.f32 %v919_v60 }
 0x432   : > { %1656 = vtanh.f32 %v914_v6  ;;  %v1390_v39 = vpop.f32.mrb[10].mxu1 }
 0x433   : > { %v929_v10 = vadd.f32 %v1390_v39, %v1117_v38  ;;  %v923_v15 = vpop.f32.mrb[11].mxu1 }
 0x434   : > { %v924_v40 = vadd.f32 %v1117_v38, %v923_v15 }
 0x435   : > { %1658 = vtanh.f32 %v929_v10 }
 0x436   : > { %1660 = vtanh.f32 %v924_v40  ;;  %v1393_v3 = vpop.f32.mrb[12].mxu1 }
 0x437   : > { %v939_v17 = vadd.f32 %v1393_v3, %v1117_v38  ;;  %v933_v5 = vpop.f32.mrb[13].mxu1 }
 0x438   : > { %v934_v18 = vadd.f32 %v1117_v38, %v933_v5 }
 0x439   : > { %1662 = vtanh.f32 %v939_v17 }
 0x43a   : > { %1664 = vtanh.f32 %v934_v18  ;;  %v1396_v19 = vpop.f32.mrb[14].mxu1 }
 0x43b   : > { %v1655_v21 = vpop.eup %1654  ;;  %v949_v24 = vadd.f32 %v1396_v19, %v1117_v38  ;;  %v943_v25 = vpop.f32.mrb[15].mxu1 }
 0x43c   : > { %v1657_v27 = vpop.eup %1656  ;;  %v961_v14 = vmul.f32 0.16666667, %v1655_v21  ;;  %v944_v30 = vadd.f32 %v1117_v38, %v943_v25 }
 0x43d   : > { %v960_v31 = vmul.f32 0.16666667, %v1657_v27  ;;  %1666 = vtanh.f32 %v949_v24 }
 0x43e   : > { %v969_v32 = vadd.f32 %v961_v14, %v832_v56  ;;  %1668 = vtanh.f32 %v944_v30 }
 0x43f   : > { %v1659_v16 = vpop.eup %1658  ;;  %v968_v33 = vadd.f32 %v960_v31, %v831_v59 }
 0x440   : > { %v1661_v41 = vpop.eup %1660  ;;  %977 = vst [vmem:[%s340_s12 + $0x8] sm:$0xff] %v969_v32  ;;  %v963_v42 = vmul.f32 0.16666667, %v1659_v16 }
 0x441   : > { %976 = vst [vmem:[%s340_s12] sm:$0xff] %v968_v33  ;;  %v962_v43 = vmul.f32 0.16666667, %v1661_v41 }
 0x442   : > { %v971_v44 = vadd.f32 %v963_v42, %v834_v9 }
 0x443   : > { %v1663_v45 = vpop.eup %1662  ;;  %v970_v47 = vadd.f32 %v962_v43, %v833_v34 }
 0x444   : > { %v1665_v48 = vpop.eup %1664  ;;  %979 = vst [vmem:[%s340_s12 + $0x18] sm:$0xff] %v971_v44  ;;  %v965_v49 = vmul.f32 0.16666667, %v1663_v45 }
 0x445   : > { %978 = vst [vmem:[%s340_s12 + $0x10] sm:$0xff] %v970_v47  ;;  %v964_v22 = vmul.f32 0.16666667, %v1665_v48 }
 0x446   : > { %v973_v50 = vadd.f32 %v965_v49, %v836_v4 }
 0x447   : > { %v1667_v51 = vpop.eup %1666  ;;  %v972_v52 = vadd.f32 %v964_v22, %v835_v36 }
 0x448   : > { %v1669_v54 = vpop.eup %1668  ;;  %981 = vst [vmem:[%s340_s12 + $0x28] sm:$0xff] %v973_v50  ;;  %v967_v55 = vmul.f32 0.16666667, %v1667_v51 }
 0x449   : > { %980 = vst [vmem:[%s340_s12 + $0x20] sm:$0xff] %v972_v52  ;;  %v966_v56 = vmul.f32 0.16666667, %v1669_v54 }
 0x44a   : > { %v975_v58 = vadd.f32 %v967_v55, %v838_v12 }
 0x44b   : > { %v974_v59 = vadd.f32 %v966_v56, %v837_v37 }
 0x44c   : > { %983 = vst [vmem:[%s340_s12 + $0x38] sm:$0xff] %v975_v58 }
 0x44d   : > { %982 = vst [vmem:[%s340_s12 + $0x30] sm:$0xff] %v974_v59 }
 0x44e   : > { %1797 = shalt.err (!%p1794_p4)
}
 0x44f   : > { %s1798_s13 = scalar_lea.hbm %s2286_s23, 1024  ;;  %s1802_s14 = scalar_lea.hbm %s2338_s7, 4096 }
 0x450   : > { %p1799_p9 = scmp.ne.s32.totalorder %s2286_s23, %s1798_s13  ;;  %p1803_p8 = scmp.lt.u32.totalorder %s2286_s23, %s2338_s7 }
 0x451   : > { %p1804_p12 = scmp.lt.u32.totalorder %s1802_s14, %s1798_s13  ;;  %p1806_p0 = scmp.lt.u32.totalorder %s1798_s13, %s2286_s23 }
 0x452   : > { %p1800_p13 = pnand %p1799_p9, %p2062_p5 }
 0x453   : > { %p1805_p6 = por %p1804_p12, %p1803_p8 }
 0x454   : > { %p1801_p10 = pneg %p1800_p13 }
 0x455   : > { %p1807_p3 = por %p1806_p0, %p1805_p6 }
 0x457   : > { %p1808_p7 = pnand %p1807_p3, %p1801_p10 }
 0x459   : > { %1811 = shalt.err (!%p1808_p7)
}
 0x45a   : > { %s1867_s16 = smov 128   ;;  %s1868_s29 = smov 8  }
 0x45b   : > { %1539 = dma.vmem_to_hbm [thread:$0]  (%p2062_p5), %s2288_s21, 1024, %s2286_s23, %s985_s28, %s1867_s16, %s1867_s16, %s1868_s29  }
 0x45c PF: > { %s2358_s11 = sld [smem:[#allocation15_spill]]  ;;  %p1566_p11 = scmp.ge.s32.totalorder %s1858_s27, 2 }
 0x45d   : > { %s1013_s8 = sand.u32 1, %s1846_s24  }
 0x45e   : > { %s1014_s30 = scalar_lea.sflag [#allocation4], %s1013_s8 }
 0x462   : > { %p2359_p1 = scmp.ne.s32.totalorder %s2358_s11, 0 }
 0x464   : > { %p1556_p2 = pnand %p1566_p11, %p2359_p1 }
 0x466   : > { %1841 = dma.done.wait (!%p1556_p2), %s1014_s30, 1024  }
 0x467   : > { %1843 = vsyncadd (!%p1556_p2), %s1014_s30, 4294966272  ;;  %p22_p4 = scmp.ge.s32.totalorder %s2048_s22, 6   ;;  %s2360_s24 = smov %s1850_s25 }
 0x468   : > { %s2361_s25 = smov %s1854_s26  ;;  %s2362_s26 = smov %s2058_s18 }
 0x469   : > { %s2363_s27 = smov %s2048_s22  ;;  %24 = sbr.rel (!%p22_p4) target bundleno = 7 (0x7), region = 105 }
 0x470   :  { %1019 = vsyncpa [#allocation3], 1 }
 0x471   :  { %1021 = vsyncpa [#allocation3 + $0x1], 1 }
 0x472   :  { %1022 = vsyncpa [#allocation6], 1 }
 0x473   :  { %1023 = vsyncpa [#allocation9], 1 }
 0x474   :  { %1024 = vsyncpa [#allocation4], 1 }
 0x475   :  { %1026 = vsyncpa [#allocation4 + $0x1], 1 }

</bundles_post_ra>
